<compile_context>
chip_gen: v6e
topology: v6e:2x2x1
jax: 0.10.0
libtpu: 0.0.40
codegen_flags: <defaults>
</compile_context>

<pallas_src>
import functools

import jax
import jax.numpy as jnp
from jax.experimental import pallas as pl
from jax.experimental.pallas import tpu as pltpu


# ---------------------------------------------------------------------------
# Pallas kernel: whole forward pass (2-layer GRU, attention, linear) in VMEM.
# Single grid point; T is a static Python int, the time loop is fully unrolled.
# ---------------------------------------------------------------------------
def gru_attention_kernel(x_ref, p_ref, out_ref, *, T, Bp, I, H):
    f32 = jnp.float32
    G = 3 * H                       # fused gate width (r|z|n) = 96 lanes
    ri = ((I + 7) // 8) * 8         # row offset of W_h0 inside the param slab
    ob = ri + 4 * H                 # row offset of the bias block

    # --- whole time-major input slab, already flattened wrapper-side ---
    x_slab = x_ref[...]                                    # (T*Bp, I)

    # --- parameter slab views (all row offsets are multiples of 8) ---
    Wi0 = p_ref[0:I, 0:G]                                  # (I, 3H)
    Wh0 = p_ref[ri:ri + H, 0:G]                            # (H, 3H)
    Wi1 = p_ref[ri + H:ri + 2 * H, 0:G]                    # (H, 3H)
    Wh1 = p_ref[ri + 2 * H:ri + 3 * H, 0:G]                # (H, 3H)
    head_w = p_ref[ri + 3 * H:ri + 4 * H, 0:2]             # (H, 2) = [w_attn|w_lin]
    gib0 = p_ref[ob + 0:ob + 1, 0:G]                       # (1, 3H) fused gi bias L0
    ghb0 = p_ref[ob + 1:ob + 2, 0:G]                       # (1, 3H) = [0|0|b_hn] L0
    gib1 = p_ref[ob + 2:ob + 3, 0:G]
    ghb1 = p_ref[ob + 3:ob + 4, 0:G]
    head_b = p_ref[ob + 4:ob + 5, 0:2]                     # (1, 2) = [0 | b_lin]

    def run_layer(in_slab, Wi, Wh, gi_b, gh_b):
        # Hoisted fused input projection: one matmul + one lane-dense bias add.
        gi_slab = jnp.dot(in_slab, Wi, preferred_element_type=f32) + gi_b  # (T*Bp, 3H)
        # Hoist the gh-bias broadcast out of the (unrolled) time loop.
        gh_bias = jnp.broadcast_to(gh_b, (Bp, G))                          # (Bp, 3H)

        # TODO(synk): stage the fused (H, 3H) recurrent RHS in MXU weight regs
        # across the T steps via pltpu.matmul_push_rhs / matmul_acc_lhs /
        # matmul_pop (kept on jnp.dot for lowering safety at these tiny shapes).
        h = jnp.zeros((Bp, H), f32)
        outs = []
        for t in range(T):
            gi = gi_slab[t * Bp:(t + 1) * Bp, :]                           # aligned (Bp, 3H)
            gh = jnp.dot(h, Wh, preferred_element_type=f32) + gh_bias      # ONE matmul/step
            rz = jax.nn.sigmoid(gi[:, :2 * H] + gh[:, :2 * H])             # fused r,z
            r = rz[:, :H]
            z = rz[:, H:]
            n = jnp.tanh(gi[:, 2 * H:] + r * gh[:, 2 * H:])                # gh_n includes b_hn
            h = n + z * (h - n)                                            # == (1-z)*n + z*h
            outs.append(h)
        return jnp.concatenate(outs, axis=0)                               # (T*Bp, H)

    # --- stacked GRU ---
    slab0 = run_layer(x_slab, Wi0, Wh0, gib0, ghb0)
    slab1 = run_layer(slab0, Wi1, Wh1, gib1, ghb1)

    # --- fused attention-score + linear-head projection: one matmul ---
    # sum_t attn_t == 1, so folding b_lin into the per-step projection is exact.
    ho = jnp.dot(slab1, head_w, preferred_element_type=f32) + head_b       # (T*Bp, 2)

    scores = [ho[t * Bp:(t + 1) * Bp, 0:1] for t in range(T)]              # T x (Bp, 1)
    projs = [ho[t * Bp:(t + 1) * Bp, 1:2] for t in range(T)]               # T x (Bp, 1)

    # softmax over time (PyTorch dim=1) as elementwise ops over (Bp,1) tiles
    m = scores[0]
    for t in range(1, T):
        m = jnp.maximum(m, scores[t])
    es = [jnp.exp(s - m) for s in scores]
    denom = es[0]
    for t in range(1, T):
        denom = denom + es[t]
    inv = 1.0 / denom

    pred = jnp.zeros((Bp, 1), f32)
    for t in range(T):
        a_t = es[t] * inv
        out_ref[t, :, :] = a_t                 # attention weight for step t
        pred = pred + a_t * projs[t]
    out_ref[T, :, :] = pred                    # prediction row


# ---------------------------------------------------------------------------
# Wrapper-side parameter packing (done once): 11 tensors -> ONE (rows,128) slab.
# Row layout (all block offsets multiples of 8):
#   [0:ri)            Wi0  (I, 3H)          ri = round_up(I, 8)
#   [ri:ri+H)         Wh0  (H, 3H)
#   [ri+H:ri+2H)      Wi1  (H, 3H)
#   [ri+2H:ri+3H)     Wh1  (H, 3H)
#   [ri+3H:ri+4H)     head_w (H, 2) = [w_attn | w_lin]
#   [ri+4H: +5)       bias rows: gi_b0, gh_b0, gi_b1, gh_b1, head_b
# ---------------------------------------------------------------------------
def pack_params(params):
    f32 = jnp.float32
    H = params["whh0"].shape[1]
    I = params["wih0"].shape[1]
    assert H % 8 == 0 and 3 * H <= 128, "fused gate block must fit one 128-lane vreg"

    def layer_blocks(wih, whh, bih, bhh):
        # PyTorch gate order r, z, n; pack gates along the lane axis.
        Wi = jnp.concatenate([wih[g * H:(g + 1) * H, :].T for g in range(3)],
                             axis=1).astype(f32)                      # (in, 3H)
        Wh = jnp.concatenate([whh[g * H:(g + 1) * H, :].T for g in range(3)],
                             axis=1).astype(f32)                      # (H, 3H)
        bi = bih.reshape(3, H).astype(f32)
        bh = bhh.reshape(3, H).astype(f32)
        gi_b = jnp.concatenate([bi[0] + bh[0],      # r: both biases into gi
                                bi[1] + bh[1],      # z: both biases into gi
                                bi[2]]).reshape(1, 3 * H)             # n: input bias only
        gh_b = jnp.concatenate([jnp.zeros((2 * H,), f32),
                                bh[2]]).reshape(1, 3 * H)             # [0 | 0 | b_hn]
        return Wi, Wh, gi_b, gh_b

    Wi0, Wh0, gib0, ghb0 = layer_blocks(params["wih0"], params["whh0"],
                                        params["bih0"], params["bhh0"])
    Wi1, Wh1, gib1, ghb1 = layer_blocks(params["wih1"], params["whh1"],
                                        params["bih1"], params["bhh1"])

    head_w = jnp.concatenate([params["wattn"], params["wlin"].T], axis=1).astype(f32)  # (H,2)
    head_b = jnp.concatenate([jnp.zeros((1, 1), f32),
                              params["blin"].reshape(1, 1).astype(f32)], axis=1)       # (1,2)

    ri = ((I + 7) // 8) * 8
    rows = ri + 4 * H + 8
    slab = jnp.zeros((rows, 128), f32)

    def place(s, row, block):
        r, c = block.shape
        return s.at[row:row + r, 0:c].set(block)

    slab = place(slab, 0, Wi0)
    slab = place(slab, ri, Wh0)
    slab = place(slab, ri + H, Wi1)
    slab = place(slab, ri + 2 * H, Wh1)
    slab = place(slab, ri + 3 * H, head_w)
    ob = ri + 4 * H
    slab = place(slab, ob + 0, gib0)
    slab = place(slab, ob + 1, ghb0)
    slab = place(slab, ob + 2, gib1)
    slab = place(slab, ob + 3, ghb1)
    slab = place(slab, ob + 4, head_b)
    return slab


# ---------------------------------------------------------------------------
# Jitted forward: layout prep + pallas_call fuse into a single dispatch.
# ---------------------------------------------------------------------------
@functools.partial(jax.jit, static_argnames=("hidden_size",))
def gru_model_with_attention(x, param_slab, *, hidden_size):
    """x: (B, T, I) batch-first f32. Returns (predictions (B,1), attn (B,T))."""
    B, T, I = x.shape
    H = hidden_size
    Bp = ((B + 7) // 8) * 8                       # pad batch to a full sublane group

    xp = jnp.zeros((Bp, T, I), jnp.float32).at[:B, :, :].set(x.astype(jnp.float32))
    x_tm = jnp.transpose(xp, (1, 0, 2)).reshape(T * Bp, I)   # time-major (T*Bp, I)

    G = 3 * H
    flops = 2 * T * Bp * (I * G + 3 * H * G + 2 * H)
    transcendentals = 2 * T * Bp * G + T * Bp
    bytes_accessed = (x_tm.size + param_slab.size + (T + 1) * Bp) * 4

    vmem = pl.BlockSpec(memory_space=pltpu.MemorySpace.VMEM)
    kernel = functools.partial(gru_attention_kernel, T=T, Bp=Bp, I=I, H=H)

    out = pl.pallas_call(
        kernel,
        out_shape=jax.ShapeDtypeStruct((T + 1, Bp, 1), jnp.float32),
        in_specs=[vmem, vmem],
        out_specs=vmem,
        cost_estimate=pl.CostEstimate(flops=flops,
                                      transcendentals=transcendentals,
                                      bytes_accessed=bytes_accessed),
    )(x_tm, param_slab)

    attn = out[0:T, 0:B, 0].T            # (B, T)
    pred = out[T, 0:B, :]                # (B, 1)
    return pred, attn


# ---------------------------------------------------------------------------
# Pure-JAX reference (mirrors the PyTorch forward) for correctness check.
# ---------------------------------------------------------------------------
def reference_forward(x, params):
    B, T, I = x.shape
    H = params["whh0"].shape[1]

    def layer(seq, wih, whh, bih, bhh):
        h = jnp.zeros((B, H), jnp.float32)
        outs = []
        for t in range(T):
            gi = seq[:, t, :] @ wih.T + bih
            gh = h @ whh.T + bhh
            i_r, i_z, i_n = gi[:, :H], gi[:, H:2 * H], gi[:, 2 * H:]
            h_r, h_z, h_n = gh[:, :H], gh[:, H:2 * H], gh[:, 2 * H:]
            r = jax.nn.sigmoid(i_r + h_r)
            z = jax.nn.sigmoid(i_z + h_z)
            n = jnp.tanh(i_n + r * h_n)
            h = (1.0 - z) * n + z * h
            outs.append(h)
        return jnp.stack(outs, axis=1)                        # (B, T, H)

    h0 = layer(x, params["wih0"], params["whh0"], params["bih0"], params["bhh0"])
    h1 = layer(h0, params["wih1"], params["whh1"], params["bih1"], params["bhh1"])
    scores = jnp.squeeze(h1 @ params["wattn"], -1)            # (B, T)
    attn = jax.nn.softmax(scores, axis=1)
    context = jnp.squeeze(attn[:, None, :] @ h1, 1)           # (B, H)
    pred = context @ params["wlin"].T + params["blin"]        # (B, 1)
    return pred, attn


# ---------------------------------------------------------------------------
if __name__ == "__main__":
    # Small shapes consistent with the module: batch=4, seq=8, features=8,
    # hidden=32, num_layers=2, output_size=1.
    B, T, I, H, OUT = 4, 8, 8, 32, 1

    key = jax.random.PRNGKey(0)
    ks = jax.random.split(key, 12)
    scale = 1.0 / jnp.sqrt(H)
    params = {
        "wih0":  jax.random.uniform(ks[0], (3 * H, I), minval=-scale, maxval=scale),
        "whh0":  jax.random.uniform(ks[1], (3 * H, H), minval=-scale, maxval=scale),
        "bih0":  jax.random.uniform(ks[2], (3 * H,),   minval=-scale, maxval=scale),
        "bhh0":  jax.random.uniform(ks[3], (3 * H,),   minval=-scale, maxval=scale),
        "wih1":  jax.random.uniform(ks[4], (3 * H, H), minval=-scale, maxval=scale),
        "whh1":  jax.random.uniform(ks[5], (3 * H, H), minval=-scale, maxval=scale),
        "bih1":  jax.random.uniform(ks[6], (3 * H,),   minval=-scale, maxval=scale),
        "bhh1":  jax.random.uniform(ks[7], (3 * H,),   minval=-scale, maxval=scale),
        "wattn": jax.random.normal(ks[8], (H, 1)) * 0.1,       # xavier-ish
        "wlin":  jax.random.uniform(ks[9], (OUT, H), minval=-scale, maxval=scale),
        "blin":  jax.random.uniform(ks[10], (OUT,),  minval=-scale, maxval=scale),
    }
    params = {k: v.astype(jnp.float32) for k, v in params.items()}

    x = jax.random.normal(ks[11], (B, T, I), dtype=jnp.float32)

    slab = pack_params(params)
    pred, attn = gru_model_with_attention(x, slab, hidden_size=H)
    jax.block_until_ready((pred, attn))

    pred_ref, attn_ref = reference_forward(x, params)
    assert pred.shape == (B, OUT) and attn.shape == (B, T)
    assert jnp.allclose(pred, pred_ref, rtol=1e-4, atol=1e-5)
    assert jnp.allclose(attn, attn_ref, rtol=1e-4, atol=1e-5)

    print("KERNEL_OK")
</pallas_src>

<mosaic_0001>
module attributes {stable_mosaic.version = 11 : i64} {
  func.func @gru_attention_kernel(%arg0: memref<64x8xf32, #tpu.memory_space<vmem>>, %arg1: memref<144x128xf32, #tpu.memory_space<vmem>>, %arg2: memref<9x8x1xf32, #tpu.memory_space<vmem>>) attributes {dimension_semantics = [], scalar_prefetch = 0 : i64, scratch_operands = 0 : i64, tpu.core_type = #tpu.core_type<tc>} {
    %c0 = arith.constant 0 : index
    %c0_0 = arith.constant 0 : index
    %0 = vector.load %arg0[%c0, %c0_0] : memref<64x8xf32, #tpu.memory_space<vmem>>, vector<64x8xf32>
    %c0_1 = arith.constant 0 : index
    %c0_2 = arith.constant 0 : index
    %1 = vector.load %arg1[%c0_1, %c0_2] : memref<144x128xf32, #tpu.memory_space<vmem>>, vector<8x96xf32>
    %c8 = arith.constant 8 : index
    %c0_3 = arith.constant 0 : index
    %2 = vector.load %arg1[%c8, %c0_3] : memref<144x128xf32, #tpu.memory_space<vmem>>, vector<32x96xf32>
    %c40 = arith.constant 40 : index
    %c0_4 = arith.constant 0 : index
    %3 = vector.load %arg1[%c40, %c0_4] : memref<144x128xf32, #tpu.memory_space<vmem>>, vector<32x96xf32>
    %c72 = arith.constant 72 : index
    %c0_5 = arith.constant 0 : index
    %4 = vector.load %arg1[%c72, %c0_5] : memref<144x128xf32, #tpu.memory_space<vmem>>, vector<32x96xf32>
    %c104 = arith.constant 104 : index
    %c0_6 = arith.constant 0 : index
    %5 = vector.load %arg1[%c104, %c0_6] : memref<144x128xf32, #tpu.memory_space<vmem>>, vector<32x2xf32>
    %c136 = arith.constant 136 : index
    %c0_7 = arith.constant 0 : index
    %6 = vector.load %arg1[%c136, %c0_7] : memref<144x128xf32, #tpu.memory_space<vmem>>, vector<1x96xf32>
    %c137 = arith.constant 137 : index
    %c0_8 = arith.constant 0 : index
    %7 = vector.load %arg1[%c137, %c0_8] : memref<144x128xf32, #tpu.memory_space<vmem>>, vector<1x96xf32>
    %c138 = arith.constant 138 : index
    %c0_9 = arith.constant 0 : index
    %8 = vector.load %arg1[%c138, %c0_9] : memref<144x128xf32, #tpu.memory_space<vmem>>, vector<1x96xf32>
    %c139 = arith.constant 139 : index
    %c0_10 = arith.constant 0 : index
    %9 = vector.load %arg1[%c139, %c0_10] : memref<144x128xf32, #tpu.memory_space<vmem>>, vector<1x96xf32>
    %c140 = arith.constant 140 : index
    %c0_11 = arith.constant 0 : index
    %10 = vector.load %arg1[%c140, %c0_11] : memref<144x128xf32, #tpu.memory_space<vmem>>, vector<1x2xf32>
    %cst = arith.constant dense<0.000000e+00> : vector<64x96xf32>
    %11 = tpu.matmul %0, %1, %cst {dimension_numbers = #tpu.dot_dimension_numbers<[1], [0], [0], [1], [0, 0, 1, 1], [], []>} : vector<64x8xf32>, vector<8x96xf32>, vector<64x96xf32> -> vector<64x96xf32>
    %12 = vector.broadcast %6 : vector<1x96xf32> to vector<64x96xf32>
    %13 = arith.addf %11, %12 : vector<64x96xf32>
    %14 = vector.shape_cast %7 : vector<1x96xf32> to vector<1x96xf32>
    %15 = vector.broadcast %14 : vector<1x96xf32> to vector<8x96xf32>
    %cst_12 = arith.constant 0.000000e+00 : f32
    %16 = vector.broadcast %cst_12 : f32 to vector<8x32xf32>
    %17 = vector.extract_strided_slice %13 {offsets = [0, 0], sizes = [8, 96], strides = [1, 1]} : vector<64x96xf32> to vector<8x96xf32>
    %cst_13 = arith.constant dense<0.000000e+00> : vector<8x96xf32>
    %18 = tpu.matmul %16, %2, %cst_13 {dimension_numbers = #tpu.dot_dimension_numbers<[1], [0], [0], [1], [0, 0, 1, 1], [], []>} : vector<8x32xf32>, vector<32x96xf32>, vector<8x96xf32> -> vector<8x96xf32>
    %19 = arith.addf %18, %15 : vector<8x96xf32>
    %20 = vector.extract_strided_slice %17 {offsets = [0, 0], sizes = [8, 64], strides = [1, 1]} : vector<8x96xf32> to vector<8x64xf32>
    %21 = vector.extract_strided_slice %19 {offsets = [0, 0], sizes = [8, 64], strides = [1, 1]} : vector<8x96xf32> to vector<8x64xf32>
    %22 = arith.addf %20, %21 : vector<8x64xf32>
    %23 = arith.negf %22 : vector<8x64xf32>
    %24 = math.exp %23 : vector<8x64xf32>
    %cst_14 = arith.constant 1.000000e+00 : f32
    %25 = vector.broadcast %cst_14 : f32 to vector<8x64xf32>
    %26 = arith.addf %25, %24 : vector<8x64xf32>
    %27 = arith.divf %25, %26 : vector<8x64xf32>
    %28 = vector.extract_strided_slice %27 {offsets = [0, 0], sizes = [8, 32], strides = [1, 1]} : vector<8x64xf32> to vector<8x32xf32>
    %29 = vector.extract_strided_slice %27 {offsets = [0, 32], sizes = [8, 32], strides = [1, 1]} : vector<8x64xf32> to vector<8x32xf32>
    %30 = vector.extract_strided_slice %17 {offsets = [0, 64], sizes = [8, 32], strides = [1, 1]} : vector<8x96xf32> to vector<8x32xf32>
    %31 = vector.extract_strided_slice %19 {offsets = [0, 64], sizes = [8, 32], strides = [1, 1]} : vector<8x96xf32> to vector<8x32xf32>
    %32 = arith.mulf %28, %31 : vector<8x32xf32>
    %33 = arith.addf %30, %32 : vector<8x32xf32>
    %34 = math.tanh %33 : vector<8x32xf32>
    %35 = arith.subf %16, %34 : vector<8x32xf32>
    %36 = arith.mulf %29, %35 : vector<8x32xf32>
    %37 = arith.addf %34, %36 : vector<8x32xf32>
    %38 = vector.extract_strided_slice %13 {offsets = [8, 0], sizes = [8, 96], strides = [1, 1]} : vector<64x96xf32> to vector<8x96xf32>
    %cst_15 = arith.constant dense<0.000000e+00> : vector<8x96xf32>
    %39 = tpu.matmul %37, %2, %cst_15 {dimension_numbers = #tpu.dot_dimension_numbers<[1], [0], [0], [1], [0, 0, 1, 1], [], []>} : vector<8x32xf32>, vector<32x96xf32>, vector<8x96xf32> -> vector<8x96xf32>
    %40 = arith.addf %39, %15 : vector<8x96xf32>
    %41 = vector.extract_strided_slice %38 {offsets = [0, 0], sizes = [8, 64], strides = [1, 1]} : vector<8x96xf32> to vector<8x64xf32>
    %42 = vector.extract_strided_slice %40 {offsets = [0, 0], sizes = [8, 64], strides = [1, 1]} : vector<8x96xf32> to vector<8x64xf32>
    %43 = arith.addf %41, %42 : vector<8x64xf32>
    %44 = arith.negf %43 : vector<8x64xf32>
    %45 = math.exp %44 : vector<8x64xf32>
    %cst_16 = arith.constant 1.000000e+00 : f32
    %46 = vector.broadcast %cst_16 : f32 to vector<8x64xf32>
    %47 = arith.addf %46, %45 : vector<8x64xf32>
    %48 = arith.divf %46, %47 : vector<8x64xf32>
    %49 = vector.extract_strided_slice %48 {offsets = [0, 0], sizes = [8, 32], strides = [1, 1]} : vector<8x64xf32> to vector<8x32xf32>
    %50 = vector.extract_strided_slice %48 {offsets = [0, 32], sizes = [8, 32], strides = [1, 1]} : vector<8x64xf32> to vector<8x32xf32>
    %51 = vector.extract_strided_slice %38 {offsets = [0, 64], sizes = [8, 32], strides = [1, 1]} : vector<8x96xf32> to vector<8x32xf32>
    %52 = vector.extract_strided_slice %40 {offsets = [0, 64], sizes = [8, 32], strides = [1, 1]} : vector<8x96xf32> to vector<8x32xf32>
    %53 = arith.mulf %49, %52 : vector<8x32xf32>
    %54 = arith.addf %51, %53 : vector<8x32xf32>
    %55 = math.tanh %54 : vector<8x32xf32>
    %56 = arith.subf %37, %55 : vector<8x32xf32>
    %57 = arith.mulf %50, %56 : vector<8x32xf32>
    %58 = arith.addf %55, %57 : vector<8x32xf32>
    %59 = vector.extract_strided_slice %13 {offsets = [16, 0], sizes = [8, 96], strides = [1, 1]} : vector<64x96xf32> to vector<8x96xf32>
    %cst_17 = arith.constant dense<0.000000e+00> : vector<8x96xf32>
    %60 = tpu.matmul %58, %2, %cst_17 {dimension_numbers = #tpu.dot_dimension_numbers<[1], [0], [0], [1], [0, 0, 1, 1], [], []>} : vector<8x32xf32>, vector<32x96xf32>, vector<8x96xf32> -> vector<8x96xf32>
    %61 = arith.addf %60, %15 : vector<8x96xf32>
    %62 = vector.extract_strided_slice %59 {offsets = [0, 0], sizes = [8, 64], strides = [1, 1]} : vector<8x96xf32> to vector<8x64xf32>
    %63 = vector.extract_strided_slice %61 {offsets = [0, 0], sizes = [8, 64], strides = [1, 1]} : vector<8x96xf32> to vector<8x64xf32>
    %64 = arith.addf %62, %63 : vector<8x64xf32>
    %65 = arith.negf %64 : vector<8x64xf32>
    %66 = math.exp %65 : vector<8x64xf32>
    %cst_18 = arith.constant 1.000000e+00 : f32
    %67 = vector.broadcast %cst_18 : f32 to vector<8x64xf32>
    %68 = arith.addf %67, %66 : vector<8x64xf32>
    %69 = arith.divf %67, %68 : vector<8x64xf32>
    %70 = vector.extract_strided_slice %69 {offsets = [0, 0], sizes = [8, 32], strides = [1, 1]} : vector<8x64xf32> to vector<8x32xf32>
    %71 = vector.extract_strided_slice %69 {offsets = [0, 32], sizes = [8, 32], strides = [1, 1]} : vector<8x64xf32> to vector<8x32xf32>
    %72 = vector.extract_strided_slice %59 {offsets = [0, 64], sizes = [8, 32], strides = [1, 1]} : vector<8x96xf32> to vector<8x32xf32>
    %73 = vector.extract_strided_slice %61 {offsets = [0, 64], sizes = [8, 32], strides = [1, 1]} : vector<8x96xf32> to vector<8x32xf32>
    %74 = arith.mulf %70, %73 : vector<8x32xf32>
    %75 = arith.addf %72, %74 : vector<8x32xf32>
    %76 = math.tanh %75 : vector<8x32xf32>
    %77 = arith.subf %58, %76 : vector<8x32xf32>
    %78 = arith.mulf %71, %77 : vector<8x32xf32>
    %79 = arith.addf %76, %78 : vector<8x32xf32>
    %80 = vector.extract_strided_slice %13 {offsets = [24, 0], sizes = [8, 96], strides = [1, 1]} : vector<64x96xf32> to vector<8x96xf32>
    %cst_19 = arith.constant dense<0.000000e+00> : vector<8x96xf32>
    %81 = tpu.matmul %79, %2, %cst_19 {dimension_numbers = #tpu.dot_dimension_numbers<[1], [0], [0], [1], [0, 0, 1, 1], [], []>} : vector<8x32xf32>, vector<32x96xf32>, vector<8x96xf32> -> vector<8x96xf32>
    %82 = arith.addf %81, %15 : vector<8x96xf32>
    %83 = vector.extract_strided_slice %80 {offsets = [0, 0], sizes = [8, 64], strides = [1, 1]} : vector<8x96xf32> to vector<8x64xf32>
    %84 = vector.extract_strided_slice %82 {offsets = [0, 0], sizes = [8, 64], strides = [1, 1]} : vector<8x96xf32> to vector<8x64xf32>
    %85 = arith.addf %83, %84 : vector<8x64xf32>
    %86 = arith.negf %85 : vector<8x64xf32>
    %87 = math.exp %86 : vector<8x64xf32>
    %cst_20 = arith.constant 1.000000e+00 : f32
    %88 = vector.broadcast %cst_20 : f32 to vector<8x64xf32>
    %89 = arith.addf %88, %87 : vector<8x64xf32>
    %90 = arith.divf %88, %89 : vector<8x64xf32>
    %91 = vector.extract_strided_slice %90 {offsets = [0, 0], sizes = [8, 32], strides = [1, 1]} : vector<8x64xf32> to vector<8x32xf32>
    %92 = vector.extract_strided_slice %90 {offsets = [0, 32], sizes = [8, 32], strides = [1, 1]} : vector<8x64xf32> to vector<8x32xf32>
    %93 = vector.extract_strided_slice %80 {offsets = [0, 64], sizes = [8, 32], strides = [1, 1]} : vector<8x96xf32> to vector<8x32xf32>
    %94 = vector.extract_strided_slice %82 {offsets = [0, 64], sizes = [8, 32], strides = [1, 1]} : vector<8x96xf32> to vector<8x32xf32>
    %95 = arith.mulf %91, %94 : vector<8x32xf32>
    %96 = arith.addf %93, %95 : vector<8x32xf32>
    %97 = math.tanh %96 : vector<8x32xf32>
    %98 = arith.subf %79, %97 : vector<8x32xf32>
    %99 = arith.mulf %92, %98 : vector<8x32xf32>
    %100 = arith.addf %97, %99 : vector<8x32xf32>
    %101 = vector.extract_strided_slice %13 {offsets = [32, 0], sizes = [8, 96], strides = [1, 1]} : vector<64x96xf32> to vector<8x96xf32>
    %cst_21 = arith.constant dense<0.000000e+00> : vector<8x96xf32>
    %102 = tpu.matmul %100, %2, %cst_21 {dimension_numbers = #tpu.dot_dimension_numbers<[1], [0], [0], [1], [0, 0, 1, 1], [], []>} : vector<8x32xf32>, vector<32x96xf32>, vector<8x96xf32> -> vector<8x96xf32>
    %103 = arith.addf %102, %15 : vector<8x96xf32>
    %104 = vector.extract_strided_slice %101 {offsets = [0, 0], sizes = [8, 64], strides = [1, 1]} : vector<8x96xf32> to vector<8x64xf32>
    %105 = vector.extract_strided_slice %103 {offsets = [0, 0], sizes = [8, 64], strides = [1, 1]} : vector<8x96xf32> to vector<8x64xf32>
    %106 = arith.addf %104, %105 : vector<8x64xf32>
    %107 = arith.negf %106 : vector<8x64xf32>
    %108 = math.exp %107 : vector<8x64xf32>
    %cst_22 = arith.constant 1.000000e+00 : f32
    %109 = vector.broadcast %cst_22 : f32 to vector<8x64xf32>
    %110 = arith.addf %109, %108 : vector<8x64xf32>
    %111 = arith.divf %109, %110 : vector<8x64xf32>
    %112 = vector.extract_strided_slice %111 {offsets = [0, 0], sizes = [8, 32], strides = [1, 1]} : vector<8x64xf32> to vector<8x32xf32>
    %113 = vector.extract_strided_slice %111 {offsets = [0, 32], sizes = [8, 32], strides = [1, 1]} : vector<8x64xf32> to vector<8x32xf32>
    %114 = vector.extract_strided_slice %101 {offsets = [0, 64], sizes = [8, 32], strides = [1, 1]} : vector<8x96xf32> to vector<8x32xf32>
    %115 = vector.extract_strided_slice %103 {offsets = [0, 64], sizes = [8, 32], strides = [1, 1]} : vector<8x96xf32> to vector<8x32xf32>
    %116 = arith.mulf %112, %115 : vector<8x32xf32>
    %117 = arith.addf %114, %116 : vector<8x32xf32>
    %118 = math.tanh %117 : vector<8x32xf32>
    %119 = arith.subf %100, %118 : vector<8x32xf32>
    %120 = arith.mulf %113, %119 : vector<8x32xf32>
    %121 = arith.addf %118, %120 : vector<8x32xf32>
    %122 = vector.extract_strided_slice %13 {offsets = [40, 0], sizes = [8, 96], strides = [1, 1]} : vector<64x96xf32> to vector<8x96xf32>
    %cst_23 = arith.constant dense<0.000000e+00> : vector<8x96xf32>
    %123 = tpu.matmul %121, %2, %cst_23 {dimension_numbers = #tpu.dot_dimension_numbers<[1], [0], [0], [1], [0, 0, 1, 1], [], []>} : vector<8x32xf32>, vector<32x96xf32>, vector<8x96xf32> -> vector<8x96xf32>
    %124 = arith.addf %123, %15 : vector<8x96xf32>
    %125 = vector.extract_strided_slice %122 {offsets = [0, 0], sizes = [8, 64], strides = [1, 1]} : vector<8x96xf32> to vector<8x64xf32>
    %126 = vector.extract_strided_slice %124 {offsets = [0, 0], sizes = [8, 64], strides = [1, 1]} : vector<8x96xf32> to vector<8x64xf32>
    %127 = arith.addf %125, %126 : vector<8x64xf32>
    %128 = arith.negf %127 : vector<8x64xf32>
    %129 = math.exp %128 : vector<8x64xf32>
    %cst_24 = arith.constant 1.000000e+00 : f32
    %130 = vector.broadcast %cst_24 : f32 to vector<8x64xf32>
    %131 = arith.addf %130, %129 : vector<8x64xf32>
    %132 = arith.divf %130, %131 : vector<8x64xf32>
    %133 = vector.extract_strided_slice %132 {offsets = [0, 0], sizes = [8, 32], strides = [1, 1]} : vector<8x64xf32> to vector<8x32xf32>
    %134 = vector.extract_strided_slice %132 {offsets = [0, 32], sizes = [8, 32], strides = [1, 1]} : vector<8x64xf32> to vector<8x32xf32>
    %135 = vector.extract_strided_slice %122 {offsets = [0, 64], sizes = [8, 32], strides = [1, 1]} : vector<8x96xf32> to vector<8x32xf32>
    %136 = vector.extract_strided_slice %124 {offsets = [0, 64], sizes = [8, 32], strides = [1, 1]} : vector<8x96xf32> to vector<8x32xf32>
    %137 = arith.mulf %133, %136 : vector<8x32xf32>
    %138 = arith.addf %135, %137 : vector<8x32xf32>
    %139 = math.tanh %138 : vector<8x32xf32>
    %140 = arith.subf %121, %139 : vector<8x32xf32>
    %141 = arith.mulf %134, %140 : vector<8x32xf32>
    %142 = arith.addf %139, %141 : vector<8x32xf32>
    %143 = vector.extract_strided_slice %13 {offsets = [48, 0], sizes = [8, 96], strides = [1, 1]} : vector<64x96xf32> to vector<8x96xf32>
    %cst_25 = arith.constant dense<0.000000e+00> : vector<8x96xf32>
    %144 = tpu.matmul %142, %2, %cst_25 {dimension_numbers = #tpu.dot_dimension_numbers<[1], [0], [0], [1], [0, 0, 1, 1], [], []>} : vector<8x32xf32>, vector<32x96xf32>, vector<8x96xf32> -> vector<8x96xf32>
    %145 = arith.addf %144, %15 : vector<8x96xf32>
    %146 = vector.extract_strided_slice %143 {offsets = [0, 0], sizes = [8, 64], strides = [1, 1]} : vector<8x96xf32> to vector<8x64xf32>
    %147 = vector.extract_strided_slice %145 {offsets = [0, 0], sizes = [8, 64], strides = [1, 1]} : vector<8x96xf32> to vector<8x64xf32>
    %148 = arith.addf %146, %147 : vector<8x64xf32>
    %149 = arith.negf %148 : vector<8x64xf32>
    %150 = math.exp %149 : vector<8x64xf32>
    %cst_26 = arith.constant 1.000000e+00 : f32
    %151 = vector.broadcast %cst_26 : f32 to vector<8x64xf32>
    %152 = arith.addf %151, %150 : vector<8x64xf32>
    %153 = arith.divf %151, %152 : vector<8x64xf32>
    %154 = vector.extract_strided_slice %153 {offsets = [0, 0], sizes = [8, 32], strides = [1, 1]} : vector<8x64xf32> to vector<8x32xf32>
    %155 = vector.extract_strided_slice %153 {offsets = [0, 32], sizes = [8, 32], strides = [1, 1]} : vector<8x64xf32> to vector<8x32xf32>
    %156 = vector.extract_strided_slice %143 {offsets = [0, 64], sizes = [8, 32], strides = [1, 1]} : vector<8x96xf32> to vector<8x32xf32>
    %157 = vector.extract_strided_slice %145 {offsets = [0, 64], sizes = [8, 32], strides = [1, 1]} : vector<8x96xf32> to vector<8x32xf32>
    %158 = arith.mulf %154, %157 : vector<8x32xf32>
    %159 = arith.addf %156, %158 : vector<8x32xf32>
    %160 = math.tanh %159 : vector<8x32xf32>
    %161 = arith.subf %142, %160 : vector<8x32xf32>
    %162 = arith.mulf %155, %161 : vector<8x32xf32>
    %163 = arith.addf %160, %162 : vector<8x32xf32>
    %164 = vector.extract_strided_slice %13 {offsets = [56, 0], sizes = [8, 96], strides = [1, 1]} : vector<64x96xf32> to vector<8x96xf32>
    %cst_27 = arith.constant dense<0.000000e+00> : vector<8x96xf32>
    %165 = tpu.matmul %163, %2, %cst_27 {dimension_numbers = #tpu.dot_dimension_numbers<[1], [0], [0], [1], [0, 0, 1, 1], [], []>} : vector<8x32xf32>, vector<32x96xf32>, vector<8x96xf32> -> vector<8x96xf32>
    %166 = arith.addf %165, %15 : vector<8x96xf32>
    %167 = vector.extract_strided_slice %164 {offsets = [0, 0], sizes = [8, 64], strides = [1, 1]} : vector<8x96xf32> to vector<8x64xf32>
    %168 = vector.extract_strided_slice %166 {offsets = [0, 0], sizes = [8, 64], strides = [1, 1]} : vector<8x96xf32> to vector<8x64xf32>
    %169 = arith.addf %167, %168 : vector<8x64xf32>
    %170 = arith.negf %169 : vector<8x64xf32>
    %171 = math.exp %170 : vector<8x64xf32>
    %cst_28 = arith.constant 1.000000e+00 : f32
    %172 = vector.broadcast %cst_28 : f32 to vector<8x64xf32>
    %173 = arith.addf %172, %171 : vector<8x64xf32>
    %174 = arith.divf %172, %173 : vector<8x64xf32>
    %175 = vector.extract_strided_slice %174 {offsets = [0, 0], sizes = [8, 32], strides = [1, 1]} : vector<8x64xf32> to vector<8x32xf32>
    %176 = vector.extract_strided_slice %174 {offsets = [0, 32], sizes = [8, 32], strides = [1, 1]} : vector<8x64xf32> to vector<8x32xf32>
    %177 = vector.extract_strided_slice %164 {offsets = [0, 64], sizes = [8, 32], strides = [1, 1]} : vector<8x96xf32> to vector<8x32xf32>
    %178 = vector.extract_strided_slice %166 {offsets = [0, 64], sizes = [8, 32], strides = [1, 1]} : vector<8x96xf32> to vector<8x32xf32>
    %179 = arith.mulf %175, %178 : vector<8x32xf32>
    %180 = arith.addf %177, %179 : vector<8x32xf32>
    %181 = math.tanh %180 : vector<8x32xf32>
    %182 = arith.subf %163, %181 : vector<8x32xf32>
    %183 = arith.mulf %176, %182 : vector<8x32xf32>
    %184 = arith.addf %181, %183 : vector<8x32xf32>
    %185 = tpu.concatenate %37, %58, %79, %100, %121, %142, %163, %184 in 0 : vector<8x32xf32>, vector<8x32xf32>, vector<8x32xf32>, vector<8x32xf32>, vector<8x32xf32>, vector<8x32xf32>, vector<8x32xf32>, vector<8x32xf32> -> vector<64x32xf32>
    %cst_29 = arith.constant dense<0.000000e+00> : vector<64x96xf32>
    %186 = tpu.matmul %185, %3, %cst_29 {dimension_numbers = #tpu.dot_dimension_numbers<[1], [0], [0], [1], [0, 0, 1, 1], [], []>} : vector<64x32xf32>, vector<32x96xf32>, vector<64x96xf32> -> vector<64x96xf32>
    %187 = vector.broadcast %8 : vector<1x96xf32> to vector<64x96xf32>
    %188 = arith.addf %186, %187 : vector<64x96xf32>
    %189 = vector.shape_cast %9 : vector<1x96xf32> to vector<1x96xf32>
    %190 = vector.broadcast %189 : vector<1x96xf32> to vector<8x96xf32>
    %cst_30 = arith.constant 0.000000e+00 : f32
    %191 = vector.broadcast %cst_30 : f32 to vector<8x32xf32>
    %192 = vector.extract_strided_slice %188 {offsets = [0, 0], sizes = [8, 96], strides = [1, 1]} : vector<64x96xf32> to vector<8x96xf32>
    %cst_31 = arith.constant dense<0.000000e+00> : vector<8x96xf32>
    %193 = tpu.matmul %191, %4, %cst_31 {dimension_numbers = #tpu.dot_dimension_numbers<[1], [0], [0], [1], [0, 0, 1, 1], [], []>} : vector<8x32xf32>, vector<32x96xf32>, vector<8x96xf32> -> vector<8x96xf32>
    %194 = arith.addf %193, %190 : vector<8x96xf32>
    %195 = vector.extract_strided_slice %192 {offsets = [0, 0], sizes = [8, 64], strides = [1, 1]} : vector<8x96xf32> to vector<8x64xf32>
    %196 = vector.extract_strided_slice %194 {offsets = [0, 0], sizes = [8, 64], strides = [1, 1]} : vector<8x96xf32> to vector<8x64xf32>
    %197 = arith.addf %195, %196 : vector<8x64xf32>
    %198 = arith.negf %197 : vector<8x64xf32>
    %199 = math.exp %198 : vector<8x64xf32>
    %cst_32 = arith.constant 1.000000e+00 : f32
    %200 = vector.broadcast %cst_32 : f32 to vector<8x64xf32>
    %201 = arith.addf %200, %199 : vector<8x64xf32>
    %202 = arith.divf %200, %201 : vector<8x64xf32>
    %203 = vector.extract_strided_slice %202 {offsets = [0, 0], sizes = [8, 32], strides = [1, 1]} : vector<8x64xf32> to vector<8x32xf32>
    %204 = vector.extract_strided_slice %202 {offsets = [0, 32], sizes = [8, 32], strides = [1, 1]} : vector<8x64xf32> to vector<8x32xf32>
    %205 = vector.extract_strided_slice %192 {offsets = [0, 64], sizes = [8, 32], strides = [1, 1]} : vector<8x96xf32> to vector<8x32xf32>
    %206 = vector.extract_strided_slice %194 {offsets = [0, 64], sizes = [8, 32], strides = [1, 1]} : vector<8x96xf32> to vector<8x32xf32>
    %207 = arith.mulf %203, %206 : vector<8x32xf32>
    %208 = arith.addf %205, %207 : vector<8x32xf32>
    %209 = math.tanh %208 : vector<8x32xf32>
    %210 = arith.subf %191, %209 : vector<8x32xf32>
    %211 = arith.mulf %204, %210 : vector<8x32xf32>
    %212 = arith.addf %209, %211 : vector<8x32xf32>
    %213 = vector.extract_strided_slice %188 {offsets = [8, 0], sizes = [8, 96], strides = [1, 1]} : vector<64x96xf32> to vector<8x96xf32>
    %cst_33 = arith.constant dense<0.000000e+00> : vector<8x96xf32>
    %214 = tpu.matmul %212, %4, %cst_33 {dimension_numbers = #tpu.dot_dimension_numbers<[1], [0], [0], [1], [0, 0, 1, 1], [], []>} : vector<8x32xf32>, vector<32x96xf32>, vector<8x96xf32> -> vector<8x96xf32>
    %215 = arith.addf %214, %190 : vector<8x96xf32>
    %216 = vector.extract_strided_slice %213 {offsets = [0, 0], sizes = [8, 64], strides = [1, 1]} : vector<8x96xf32> to vector<8x64xf32>
    %217 = vector.extract_strided_slice %215 {offsets = [0, 0], sizes = [8, 64], strides = [1, 1]} : vector<8x96xf32> to vector<8x64xf32>
    %218 = arith.addf %216, %217 : vector<8x64xf32>
    %219 = arith.negf %218 : vector<8x64xf32>
    %220 = math.exp %219 : vector<8x64xf32>
    %cst_34 = arith.constant 1.000000e+00 : f32
    %221 = vector.broadcast %cst_34 : f32 to vector<8x64xf32>
    %222 = arith.addf %221, %220 : vector<8x64xf32>
    %223 = arith.divf %221, %222 : vector<8x64xf32>
    %224 = vector.extract_strided_slice %223 {offsets = [0, 0], sizes = [8, 32], strides = [1, 1]} : vector<8x64xf32> to vector<8x32xf32>
    %225 = vector.extract_strided_slice %223 {offsets = [0, 32], sizes = [8, 32], strides = [1, 1]} : vector<8x64xf32> to vector<8x32xf32>
    %226 = vector.extract_strided_slice %213 {offsets = [0, 64], sizes = [8, 32], strides = [1, 1]} : vector<8x96xf32> to vector<8x32xf32>
    %227 = vector.extract_strided_slice %215 {offsets = [0, 64], sizes = [8, 32], strides = [1, 1]} : vector<8x96xf32> to vector<8x32xf32>
    %228 = arith.mulf %224, %227 : vector<8x32xf32>
    %229 = arith.addf %226, %228 : vector<8x32xf32>
    %230 = math.tanh %229 : vector<8x32xf32>
    %231 = arith.subf %212, %230 : vector<8x32xf32>
    %232 = arith.mulf %225, %231 : vector<8x32xf32>
    %233 = arith.addf %230, %232 : vector<8x32xf32>
    %234 = vector.extract_strided_slice %188 {offsets = [16, 0], sizes = [8, 96], strides = [1, 1]} : vector<64x96xf32> to vector<8x96xf32>
    %cst_35 = arith.constant dense<0.000000e+00> : vector<8x96xf32>
    %235 = tpu.matmul %233, %4, %cst_35 {dimension_numbers = #tpu.dot_dimension_numbers<[1], [0], [0], [1], [0, 0, 1, 1], [], []>} : vector<8x32xf32>, vector<32x96xf32>, vector<8x96xf32> -> vector<8x96xf32>
    %236 = arith.addf %235, %190 : vector<8x96xf32>
    %237 = vector.extract_strided_slice %234 {offsets = [0, 0], sizes = [8, 64], strides = [1, 1]} : vector<8x96xf32> to vector<8x64xf32>
    %238 = vector.extract_strided_slice %236 {offsets = [0, 0], sizes = [8, 64], strides = [1, 1]} : vector<8x96xf32> to vector<8x64xf32>
    %239 = arith.addf %237, %238 : vector<8x64xf32>
    %240 = arith.negf %239 : vector<8x64xf32>
    %241 = math.exp %240 : vector<8x64xf32>
    %cst_36 = arith.constant 1.000000e+00 : f32
    %242 = vector.broadcast %cst_36 : f32 to vector<8x64xf32>
    %243 = arith.addf %242, %241 : vector<8x64xf32>
    %244 = arith.divf %242, %243 : vector<8x64xf32>
    %245 = vector.extract_strided_slice %244 {offsets = [0, 0], sizes = [8, 32], strides = [1, 1]} : vector<8x64xf32> to vector<8x32xf32>
    %246 = vector.extract_strided_slice %244 {offsets = [0, 32], sizes = [8, 32], strides = [1, 1]} : vector<8x64xf32> to vector<8x32xf32>
    %247 = vector.extract_strided_slice %234 {offsets = [0, 64], sizes = [8, 32], strides = [1, 1]} : vector<8x96xf32> to vector<8x32xf32>
    %248 = vector.extract_strided_slice %236 {offsets = [0, 64], sizes = [8, 32], strides = [1, 1]} : vector<8x96xf32> to vector<8x32xf32>
    %249 = arith.mulf %245, %248 : vector<8x32xf32>
    %250 = arith.addf %247, %249 : vector<8x32xf32>
    %251 = math.tanh %250 : vector<8x32xf32>
    %252 = arith.subf %233, %251 : vector<8x32xf32>
    %253 = arith.mulf %246, %252 : vector<8x32xf32>
    %254 = arith.addf %251, %253 : vector<8x32xf32>
    %255 = vector.extract_strided_slice %188 {offsets = [24, 0], sizes = [8, 96], strides = [1, 1]} : vector<64x96xf32> to vector<8x96xf32>
    %cst_37 = arith.constant dense<0.000000e+00> : vector<8x96xf32>
    %256 = tpu.matmul %254, %4, %cst_37 {dimension_numbers = #tpu.dot_dimension_numbers<[1], [0], [0], [1], [0, 0, 1, 1], [], []>} : vector<8x32xf32>, vector<32x96xf32>, vector<8x96xf32> -> vector<8x96xf32>
    %257 = arith.addf %256, %190 : vector<8x96xf32>
    %258 = vector.extract_strided_slice %255 {offsets = [0, 0], sizes = [8, 64], strides = [1, 1]} : vector<8x96xf32> to vector<8x64xf32>
    %259 = vector.extract_strided_slice %257 {offsets = [0, 0], sizes = [8, 64], strides = [1, 1]} : vector<8x96xf32> to vector<8x64xf32>
    %260 = arith.addf %258, %259 : vector<8x64xf32>
    %261 = arith.negf %260 : vector<8x64xf32>
    %262 = math.exp %261 : vector<8x64xf32>
    %cst_38 = arith.constant 1.000000e+00 : f32
    %263 = vector.broadcast %cst_38 : f32 to vector<8x64xf32>
    %264 = arith.addf %263, %262 : vector<8x64xf32>
    %265 = arith.divf %263, %264 : vector<8x64xf32>
    %266 = vector.extract_strided_slice %265 {offsets = [0, 0], sizes = [8, 32], strides = [1, 1]} : vector<8x64xf32> to vector<8x32xf32>
    %267 = vector.extract_strided_slice %265 {offsets = [0, 32], sizes = [8, 32], strides = [1, 1]} : vector<8x64xf32> to vector<8x32xf32>
    %268 = vector.extract_strided_slice %255 {offsets = [0, 64], sizes = [8, 32], strides = [1, 1]} : vector<8x96xf32> to vector<8x32xf32>
    %269 = vector.extract_strided_slice %257 {offsets = [0, 64], sizes = [8, 32], strides = [1, 1]} : vector<8x96xf32> to vector<8x32xf32>
    %270 = arith.mulf %266, %269 : vector<8x32xf32>
    %271 = arith.addf %268, %270 : vector<8x32xf32>
    %272 = math.tanh %271 : vector<8x32xf32>
    %273 = arith.subf %254, %272 : vector<8x32xf32>
    %274 = arith.mulf %267, %273 : vector<8x32xf32>
    %275 = arith.addf %272, %274 : vector<8x32xf32>
    %276 = vector.extract_strided_slice %188 {offsets = [32, 0], sizes = [8, 96], strides = [1, 1]} : vector<64x96xf32> to vector<8x96xf32>
    %cst_39 = arith.constant dense<0.000000e+00> : vector<8x96xf32>
    %277 = tpu.matmul %275, %4, %cst_39 {dimension_numbers = #tpu.dot_dimension_numbers<[1], [0], [0], [1], [0, 0, 1, 1], [], []>} : vector<8x32xf32>, vector<32x96xf32>, vector<8x96xf32> -> vector<8x96xf32>
    %278 = arith.addf %277, %190 : vector<8x96xf32>
    %279 = vector.extract_strided_slice %276 {offsets = [0, 0], sizes = [8, 64], strides = [1, 1]} : vector<8x96xf32> to vector<8x64xf32>
    %280 = vector.extract_strided_slice %278 {offsets = [0, 0], sizes = [8, 64], strides = [1, 1]} : vector<8x96xf32> to vector<8x64xf32>
    %281 = arith.addf %279, %280 : vector<8x64xf32>
    %282 = arith.negf %281 : vector<8x64xf32>
    %283 = math.exp %282 : vector<8x64xf32>
    %cst_40 = arith.constant 1.000000e+00 : f32
    %284 = vector.broadcast %cst_40 : f32 to vector<8x64xf32>
    %285 = arith.addf %284, %283 : vector<8x64xf32>
    %286 = arith.divf %284, %285 : vector<8x64xf32>
    %287 = vector.extract_strided_slice %286 {offsets = [0, 0], sizes = [8, 32], strides = [1, 1]} : vector<8x64xf32> to vector<8x32xf32>
    %288 = vector.extract_strided_slice %286 {offsets = [0, 32], sizes = [8, 32], strides = [1, 1]} : vector<8x64xf32> to vector<8x32xf32>
    %289 = vector.extract_strided_slice %276 {offsets = [0, 64], sizes = [8, 32], strides = [1, 1]} : vector<8x96xf32> to vector<8x32xf32>
    %290 = vector.extract_strided_slice %278 {offsets = [0, 64], sizes = [8, 32], strides = [1, 1]} : vector<8x96xf32> to vector<8x32xf32>
    %291 = arith.mulf %287, %290 : vector<8x32xf32>
    %292 = arith.addf %289, %291 : vector<8x32xf32>
    %293 = math.tanh %292 : vector<8x32xf32>
    %294 = arith.subf %275, %293 : vector<8x32xf32>
    %295 = arith.mulf %288, %294 : vector<8x32xf32>
    %296 = arith.addf %293, %295 : vector<8x32xf32>
    %297 = vector.extract_strided_slice %188 {offsets = [40, 0], sizes = [8, 96], strides = [1, 1]} : vector<64x96xf32> to vector<8x96xf32>
    %cst_41 = arith.constant dense<0.000000e+00> : vector<8x96xf32>
    %298 = tpu.matmul %296, %4, %cst_41 {dimension_numbers = #tpu.dot_dimension_numbers<[1], [0], [0], [1], [0, 0, 1, 1], [], []>} : vector<8x32xf32>, vector<32x96xf32>, vector<8x96xf32> -> vector<8x96xf32>
    %299 = arith.addf %298, %190 : vector<8x96xf32>
    %300 = vector.extract_strided_slice %297 {offsets = [0, 0], sizes = [8, 64], strides = [1, 1]} : vector<8x96xf32> to vector<8x64xf32>
    %301 = vector.extract_strided_slice %299 {offsets = [0, 0], sizes = [8, 64], strides = [1, 1]} : vector<8x96xf32> to vector<8x64xf32>
    %302 = arith.addf %300, %301 : vector<8x64xf32>
    %303 = arith.negf %302 : vector<8x64xf32>
    %304 = math.exp %303 : vector<8x64xf32>
    %cst_42 = arith.constant 1.000000e+00 : f32
    %305 = vector.broadcast %cst_42 : f32 to vector<8x64xf32>
    %306 = arith.addf %305, %304 : vector<8x64xf32>
    %307 = arith.divf %305, %306 : vector<8x64xf32>
    %308 = vector.extract_strided_slice %307 {offsets = [0, 0], sizes = [8, 32], strides = [1, 1]} : vector<8x64xf32> to vector<8x32xf32>
    %309 = vector.extract_strided_slice %307 {offsets = [0, 32], sizes = [8, 32], strides = [1, 1]} : vector<8x64xf32> to vector<8x32xf32>
    %310 = vector.extract_strided_slice %297 {offsets = [0, 64], sizes = [8, 32], strides = [1, 1]} : vector<8x96xf32> to vector<8x32xf32>
    %311 = vector.extract_strided_slice %299 {offsets = [0, 64], sizes = [8, 32], strides = [1, 1]} : vector<8x96xf32> to vector<8x32xf32>
    %312 = arith.mulf %308, %311 : vector<8x32xf32>
    %313 = arith.addf %310, %312 : vector<8x32xf32>
    %314 = math.tanh %313 : vector<8x32xf32>
    %315 = arith.subf %296, %314 : vector<8x32xf32>
    %316 = arith.mulf %309, %315 : vector<8x32xf32>
    %317 = arith.addf %314, %316 : vector<8x32xf32>
    %318 = vector.extract_strided_slice %188 {offsets = [48, 0], sizes = [8, 96], strides = [1, 1]} : vector<64x96xf32> to vector<8x96xf32>
    %cst_43 = arith.constant dense<0.000000e+00> : vector<8x96xf32>
    %319 = tpu.matmul %317, %4, %cst_43 {dimension_numbers = #tpu.dot_dimension_numbers<[1], [0], [0], [1], [0, 0, 1, 1], [], []>} : vector<8x32xf32>, vector<32x96xf32>, vector<8x96xf32> -> vector<8x96xf32>
    %320 = arith.addf %319, %190 : vector<8x96xf32>
    %321 = vector.extract_strided_slice %318 {offsets = [0, 0], sizes = [8, 64], strides = [1, 1]} : vector<8x96xf32> to vector<8x64xf32>
    %322 = vector.extract_strided_slice %320 {offsets = [0, 0], sizes = [8, 64], strides = [1, 1]} : vector<8x96xf32> to vector<8x64xf32>
    %323 = arith.addf %321, %322 : vector<8x64xf32>
    %324 = arith.negf %323 : vector<8x64xf32>
    %325 = math.exp %324 : vector<8x64xf32>
    %cst_44 = arith.constant 1.000000e+00 : f32
    %326 = vector.broadcast %cst_44 : f32 to vector<8x64xf32>
    %327 = arith.addf %326, %325 : vector<8x64xf32>
    %328 = arith.divf %326, %327 : vector<8x64xf32>
    %329 = vector.extract_strided_slice %328 {offsets = [0, 0], sizes = [8, 32], strides = [1, 1]} : vector<8x64xf32> to vector<8x32xf32>
    %330 = vector.extract_strided_slice %328 {offsets = [0, 32], sizes = [8, 32], strides = [1, 1]} : vector<8x64xf32> to vector<8x32xf32>
    %331 = vector.extract_strided_slice %318 {offsets = [0, 64], sizes = [8, 32], strides = [1, 1]} : vector<8x96xf32> to vector<8x32xf32>
    %332 = vector.extract_strided_slice %320 {offsets = [0, 64], sizes = [8, 32], strides = [1, 1]} : vector<8x96xf32> to vector<8x32xf32>
    %333 = arith.mulf %329, %332 : vector<8x32xf32>
    %334 = arith.addf %331, %333 : vector<8x32xf32>
    %335 = math.tanh %334 : vector<8x32xf32>
    %336 = arith.subf %317, %335 : vector<8x32xf32>
    %337 = arith.mulf %330, %336 : vector<8x32xf32>
    %338 = arith.addf %335, %337 : vector<8x32xf32>
    %339 = vector.extract_strided_slice %188 {offsets = [56, 0], sizes = [8, 96], strides = [1, 1]} : vector<64x96xf32> to vector<8x96xf32>
    %cst_45 = arith.constant dense<0.000000e+00> : vector<8x96xf32>
    %340 = tpu.matmul %338, %4, %cst_45 {dimension_numbers = #tpu.dot_dimension_numbers<[1], [0], [0], [1], [0, 0, 1, 1], [], []>} : vector<8x32xf32>, vector<32x96xf32>, vector<8x96xf32> -> vector<8x96xf32>
    %341 = arith.addf %340, %190 : vector<8x96xf32>
    %342 = vector.extract_strided_slice %339 {offsets = [0, 0], sizes = [8, 64], strides = [1, 1]} : vector<8x96xf32> to vector<8x64xf32>
    %343 = vector.extract_strided_slice %341 {offsets = [0, 0], sizes = [8, 64], strides = [1, 1]} : vector<8x96xf32> to vector<8x64xf32>
    %344 = arith.addf %342, %343 : vector<8x64xf32>
    %345 = arith.negf %344 : vector<8x64xf32>
    %346 = math.exp %345 : vector<8x64xf32>
    %cst_46 = arith.constant 1.000000e+00 : f32
    %347 = vector.broadcast %cst_46 : f32 to vector<8x64xf32>
    %348 = arith.addf %347, %346 : vector<8x64xf32>
    %349 = arith.divf %347, %348 : vector<8x64xf32>
    %350 = vector.extract_strided_slice %349 {offsets = [0, 0], sizes = [8, 32], strides = [1, 1]} : vector<8x64xf32> to vector<8x32xf32>
    %351 = vector.extract_strided_slice %349 {offsets = [0, 32], sizes = [8, 32], strides = [1, 1]} : vector<8x64xf32> to vector<8x32xf32>
    %352 = vector.extract_strided_slice %339 {offsets = [0, 64], sizes = [8, 32], strides = [1, 1]} : vector<8x96xf32> to vector<8x32xf32>
    %353 = vector.extract_strided_slice %341 {offsets = [0, 64], sizes = [8, 32], strides = [1, 1]} : vector<8x96xf32> to vector<8x32xf32>
    %354 = arith.mulf %350, %353 : vector<8x32xf32>
    %355 = arith.addf %352, %354 : vector<8x32xf32>
    %356 = math.tanh %355 : vector<8x32xf32>
    %357 = arith.subf %338, %356 : vector<8x32xf32>
    %358 = arith.mulf %351, %357 : vector<8x32xf32>
    %359 = arith.addf %356, %358 : vector<8x32xf32>
    %360 = tpu.concatenate %212, %233, %254, %275, %296, %317, %338, %359 in 0 : vector<8x32xf32>, vector<8x32xf32>, vector<8x32xf32>, vector<8x32xf32>, vector<8x32xf32>, vector<8x32xf32>, vector<8x32xf32>, vector<8x32xf32> -> vector<64x32xf32>
    %cst_47 = arith.constant dense<0.000000e+00> : vector<64x2xf32>
    %361 = tpu.matmul %360, %5, %cst_47 {dimension_numbers = #tpu.dot_dimension_numbers<[1], [0], [0], [1], [0, 0, 1, 1], [], []>} : vector<64x32xf32>, vector<32x2xf32>, vector<64x2xf32> -> vector<64x2xf32>
    %362 = vector.broadcast %10 : vector<1x2xf32> to vector<64x2xf32>
    %363 = arith.addf %361, %362 : vector<64x2xf32>
    %364 = vector.extract_strided_slice %363 {offsets = [0, 0], sizes = [8, 1], strides = [1, 1]} : vector<64x2xf32> to vector<8x1xf32>
    %365 = vector.extract_strided_slice %363 {offsets = [8, 0], sizes = [8, 1], strides = [1, 1]} : vector<64x2xf32> to vector<8x1xf32>
    %366 = vector.extract_strided_slice %363 {offsets = [16, 0], sizes = [8, 1], strides = [1, 1]} : vector<64x2xf32> to vector<8x1xf32>
    %367 = vector.extract_strided_slice %363 {offsets = [24, 0], sizes = [8, 1], strides = [1, 1]} : vector<64x2xf32> to vector<8x1xf32>
    %368 = vector.extract_strided_slice %363 {offsets = [32, 0], sizes = [8, 1], strides = [1, 1]} : vector<64x2xf32> to vector<8x1xf32>
    %369 = vector.extract_strided_slice %363 {offsets = [40, 0], sizes = [8, 1], strides = [1, 1]} : vector<64x2xf32> to vector<8x1xf32>
    %370 = vector.extract_strided_slice %363 {offsets = [48, 0], sizes = [8, 1], strides = [1, 1]} : vector<64x2xf32> to vector<8x1xf32>
    %371 = vector.extract_strided_slice %363 {offsets = [56, 0], sizes = [8, 1], strides = [1, 1]} : vector<64x2xf32> to vector<8x1xf32>
    %372 = vector.extract_strided_slice %363 {offsets = [0, 1], sizes = [8, 1], strides = [1, 1]} : vector<64x2xf32> to vector<8x1xf32>
    %373 = vector.extract_strided_slice %363 {offsets = [8, 1], sizes = [8, 1], strides = [1, 1]} : vector<64x2xf32> to vector<8x1xf32>
    %374 = vector.extract_strided_slice %363 {offsets = [16, 1], sizes = [8, 1], strides = [1, 1]} : vector<64x2xf32> to vector<8x1xf32>
    %375 = vector.extract_strided_slice %363 {offsets = [24, 1], sizes = [8, 1], strides = [1, 1]} : vector<64x2xf32> to vector<8x1xf32>
    %376 = vector.extract_strided_slice %363 {offsets = [32, 1], sizes = [8, 1], strides = [1, 1]} : vector<64x2xf32> to vector<8x1xf32>
    %377 = vector.extract_strided_slice %363 {offsets = [40, 1], sizes = [8, 1], strides = [1, 1]} : vector<64x2xf32> to vector<8x1xf32>
    %378 = vector.extract_strided_slice %363 {offsets = [48, 1], sizes = [8, 1], strides = [1, 1]} : vector<64x2xf32> to vector<8x1xf32>
    %379 = vector.extract_strided_slice %363 {offsets = [56, 1], sizes = [8, 1], strides = [1, 1]} : vector<64x2xf32> to vector<8x1xf32>
    %380 = arith.maximumf %364, %365 : vector<8x1xf32>
    %381 = arith.maximumf %380, %366 : vector<8x1xf32>
    %382 = arith.maximumf %381, %367 : vector<8x1xf32>
    %383 = arith.maximumf %382, %368 : vector<8x1xf32>
    %384 = arith.maximumf %383, %369 : vector<8x1xf32>
    %385 = arith.maximumf %384, %370 : vector<8x1xf32>
    %386 = arith.maximumf %385, %371 : vector<8x1xf32>
    %387 = arith.subf %364, %386 : vector<8x1xf32>
    %388 = math.exp %387 : vector<8x1xf32>
    %389 = arith.subf %365, %386 : vector<8x1xf32>
    %390 = math.exp %389 : vector<8x1xf32>
    %391 = arith.subf %366, %386 : vector<8x1xf32>
    %392 = math.exp %391 : vector<8x1xf32>
    %393 = arith.subf %367, %386 : vector<8x1xf32>
    %394 = math.exp %393 : vector<8x1xf32>
    %395 = arith.subf %368, %386 : vector<8x1xf32>
    %396 = math.exp %395 : vector<8x1xf32>
    %397 = arith.subf %369, %386 : vector<8x1xf32>
    %398 = math.exp %397 : vector<8x1xf32>
    %399 = arith.subf %370, %386 : vector<8x1xf32>
    %400 = math.exp %399 : vector<8x1xf32>
    %401 = arith.subf %371, %386 : vector<8x1xf32>
    %402 = math.exp %401 : vector<8x1xf32>
    %403 = arith.addf %388, %390 : vector<8x1xf32>
    %404 = arith.addf %403, %392 : vector<8x1xf32>
    %405 = arith.addf %404, %394 : vector<8x1xf32>
    %406 = arith.addf %405, %396 : vector<8x1xf32>
    %407 = arith.addf %406, %398 : vector<8x1xf32>
    %408 = arith.addf %407, %400 : vector<8x1xf32>
    %409 = arith.addf %408, %402 : vector<8x1xf32>
    %cst_48 = arith.constant 1.000000e+00 : f32
    %410 = vector.broadcast %cst_48 : f32 to vector<8x1xf32>
    %411 = arith.divf %410, %409 : vector<8x1xf32>
    %cst_49 = arith.constant 0.000000e+00 : f32
    %412 = vector.broadcast %cst_49 : f32 to vector<8x1xf32>
    %413 = arith.mulf %388, %411 : vector<8x1xf32>
    %c0_50 = arith.constant 0 : index
    %c0_51 = arith.constant 0 : index
    %c0_52 = arith.constant 0 : index
    %414 = vector.load %arg2[%c0_50, %c0_51, %c0_52] : memref<9x8x1xf32, #tpu.memory_space<vmem>>, vector<1x8x1xf32>
    %415 = vector.shape_cast %414 : vector<1x8x1xf32> to vector<8x1xf32>
    %416 = vector.shape_cast %413 : vector<8x1xf32> to vector<1x8x1xf32>
    tpu.vector_store %arg2[%c0_50, %c0_51, %c0_52], %416 {strides = array<i32>} : memref<9x8x1xf32, #tpu.memory_space<vmem>>, vector<1x8x1xf32>,
    %417 = arith.mulf %413, %372 : vector<8x1xf32>
    %418 = arith.addf %412, %417 : vector<8x1xf32>
    %419 = arith.mulf %390, %411 : vector<8x1xf32>
    %c1 = arith.constant 1 : index
    %c0_53 = arith.constant 0 : index
    %c0_54 = arith.constant 0 : index
    %420 = vector.load %arg2[%c1, %c0_53, %c0_54] : memref<9x8x1xf32, #tpu.memory_space<vmem>>, vector<1x8x1xf32>
    %421 = vector.shape_cast %420 : vector<1x8x1xf32> to vector<8x1xf32>
    %422 = vector.shape_cast %419 : vector<8x1xf32> to vector<1x8x1xf32>
    tpu.vector_store %arg2[%c1, %c0_53, %c0_54], %422 {strides = array<i32>} : memref<9x8x1xf32, #tpu.memory_space<vmem>>, vector<1x8x1xf32>,
    %423 = arith.mulf %419, %373 : vector<8x1xf32>
    %424 = arith.addf %418, %423 : vector<8x1xf32>
    %425 = arith.mulf %392, %411 : vector<8x1xf32>
    %c2 = arith.constant 2 : index
    %c0_55 = arith.constant 0 : index
    %c0_56 = arith.constant 0 : index
    %426 = vector.load %arg2[%c2, %c0_55, %c0_56] : memref<9x8x1xf32, #tpu.memory_space<vmem>>, vector<1x8x1xf32>
    %427 = vector.shape_cast %426 : vector<1x8x1xf32> to vector<8x1xf32>
    %428 = vector.shape_cast %425 : vector<8x1xf32> to vector<1x8x1xf32>
    tpu.vector_store %arg2[%c2, %c0_55, %c0_56], %428 {strides = array<i32>} : memref<9x8x1xf32, #tpu.memory_space<vmem>>, vector<1x8x1xf32>,
    %429 = arith.mulf %425, %374 : vector<8x1xf32>
    %430 = arith.addf %424, %429 : vector<8x1xf32>
    %431 = arith.mulf %394, %411 : vector<8x1xf32>
    %c3 = arith.constant 3 : index
    %c0_57 = arith.constant 0 : index
    %c0_58 = arith.constant 0 : index
    %432 = vector.load %arg2[%c3, %c0_57, %c0_58] : memref<9x8x1xf32, #tpu.memory_space<vmem>>, vector<1x8x1xf32>
    %433 = vector.shape_cast %432 : vector<1x8x1xf32> to vector<8x1xf32>
    %434 = vector.shape_cast %431 : vector<8x1xf32> to vector<1x8x1xf32>
    tpu.vector_store %arg2[%c3, %c0_57, %c0_58], %434 {strides = array<i32>} : memref<9x8x1xf32, #tpu.memory_space<vmem>>, vector<1x8x1xf32>,
    %435 = arith.mulf %431, %375 : vector<8x1xf32>
    %436 = arith.addf %430, %435 : vector<8x1xf32>
    %437 = arith.mulf %396, %411 : vector<8x1xf32>
    %c4 = arith.constant 4 : index
    %c0_59 = arith.constant 0 : index
    %c0_60 = arith.constant 0 : index
    %438 = vector.load %arg2[%c4, %c0_59, %c0_60] : memref<9x8x1xf32, #tpu.memory_space<vmem>>, vector<1x8x1xf32>
    %439 = vector.shape_cast %438 : vector<1x8x1xf32> to vector<8x1xf32>
    %440 = vector.shape_cast %437 : vector<8x1xf32> to vector<1x8x1xf32>
    tpu.vector_store %arg2[%c4, %c0_59, %c0_60], %440 {strides = array<i32>} : memref<9x8x1xf32, #tpu.memory_space<vmem>>, vector<1x8x1xf32>,
    %441 = arith.mulf %437, %376 : vector<8x1xf32>
    %442 = arith.addf %436, %441 : vector<8x1xf32>
    %443 = arith.mulf %398, %411 : vector<8x1xf32>
    %c5 = arith.constant 5 : index
    %c0_61 = arith.constant 0 : index
    %c0_62 = arith.constant 0 : index
    %444 = vector.load %arg2[%c5, %c0_61, %c0_62] : memref<9x8x1xf32, #tpu.memory_space<vmem>>, vector<1x8x1xf32>
    %445 = vector.shape_cast %444 : vector<1x8x1xf32> to vector<8x1xf32>
    %446 = vector.shape_cast %443 : vector<8x1xf32> to vector<1x8x1xf32>
    tpu.vector_store %arg2[%c5, %c0_61, %c0_62], %446 {strides = array<i32>} : memref<9x8x1xf32, #tpu.memory_space<vmem>>, vector<1x8x1xf32>,
    %447 = arith.mulf %443, %377 : vector<8x1xf32>
    %448 = arith.addf %442, %447 : vector<8x1xf32>
    %449 = arith.mulf %400, %411 : vector<8x1xf32>
    %c6 = arith.constant 6 : index
    %c0_63 = arith.constant 0 : index
    %c0_64 = arith.constant 0 : index
    %450 = vector.load %arg2[%c6, %c0_63, %c0_64] : memref<9x8x1xf32, #tpu.memory_space<vmem>>, vector<1x8x1xf32>
    %451 = vector.shape_cast %450 : vector<1x8x1xf32> to vector<8x1xf32>
    %452 = vector.shape_cast %449 : vector<8x1xf32> to vector<1x8x1xf32>
    tpu.vector_store %arg2[%c6, %c0_63, %c0_64], %452 {strides = array<i32>} : memref<9x8x1xf32, #tpu.memory_space<vmem>>, vector<1x8x1xf32>,
    %453 = arith.mulf %449, %378 : vector<8x1xf32>
    %454 = arith.addf %448, %453 : vector<8x1xf32>
    %455 = arith.mulf %402, %411 : vector<8x1xf32>
    %c7 = arith.constant 7 : index
    %c0_65 = arith.constant 0 : index
    %c0_66 = arith.constant 0 : index
    %456 = vector.load %arg2[%c7, %c0_65, %c0_66] : memref<9x8x1xf32, #tpu.memory_space<vmem>>, vector<1x8x1xf32>
    %457 = vector.shape_cast %456 : vector<1x8x1xf32> to vector<8x1xf32>
    %458 = vector.shape_cast %455 : vector<8x1xf32> to vector<1x8x1xf32>
    tpu.vector_store %arg2[%c7, %c0_65, %c0_66], %458 {strides = array<i32>} : memref<9x8x1xf32, #tpu.memory_space<vmem>>, vector<1x8x1xf32>,
    %459 = arith.mulf %455, %379 : vector<8x1xf32>
    %460 = arith.addf %454, %459 : vector<8x1xf32>
    %c8_67 = arith.constant 8 : index
    %c0_68 = arith.constant 0 : index
    %c0_69 = arith.constant 0 : index
    %461 = vector.load %arg2[%c8_67, %c0_68, %c0_69] : memref<9x8x1xf32, #tpu.memory_space<vmem>>, vector<1x8x1xf32>
    %462 = vector.shape_cast %461 : vector<1x8x1xf32> to vector<8x1xf32>
    %463 = vector.shape_cast %460 : vector<8x1xf32> to vector<1x8x1xf32>
    tpu.vector_store %arg2[%c8_67, %c0_68, %c0_69], %463 {strides = array<i32>} : memref<9x8x1xf32, #tpu.memory_space<vmem>>, vector<1x8x1xf32>,
    return
  }
}

</mosaic_0001>

<bundles_post_ra>
// kernel: gru_model_with_attention.1
= control target key start
LH: loop header
LB: loop body
LE: loop exit
PB: predicated region body
PF: predicated region fallthrough
CT: control target
= control target key end

     0   :  { %vm45_vm0 = vcmask 64512   ;;  %v2719_v5 = vmov 0.0   ;;  %vm2720_vm1 = vmmov 0   ;;  %s2721_s5 = smov 64   ;;  %s2722_s8 = smov 96   ;;  %vm179_vm2 = vcmask 261120   ;;  %s3265_s1 = inlined_call_operand.vmem [shape: f32[144,128], index: 1, kind: input, shape index: {}]   ;;  %s3266_s0 = inlined_call_operand.vmem [shape: f32[64,8], index: 0, kind: input, shape index: {}]   ;;  %s3267_s2 = inlined_call_operand.vmem [shape: f32[9,8,1], index: 2, kind: output, shape index: {}]  }
   0x1   :  { %v19_v0 = vld [vmem:[%s3265_s1] sm:$0xff]  ;;  %v16_v2 = vld [vmem:[%s3266_s0 + $0x28] sm:$0xff]  ;;  %v17_v4 = vld [vmem:[%s3266_s0 + $0x30] sm:$0xff]  ;;  %s2723_s9 = smov 32   ;;  %s2724_s17 = smov 127   ;;  %vm2110_vm3 = vcmask 7168  }
   0x2   :  { %v15_v1 = vld [vmem:[%s3266_s0 + $0x20] sm:$0xff]  ;;  %2597 = vmatprep.subr.mxu1 %v19_v0  ;;  %2367 = vmatprep.subr.mxu0 %v19_v0  ;;  %v2763_v6 = vld [vmem:[%s3265_s1 + $0x18] sm:$0xff]  ;;  %v2777_v9 = vld [vmem:[%s3265_s1 + $0x10] sm:$0xff] }
   0x3   :  { %2375 = vmatprep.mubr.msk.f32.mxu1 %vm45_vm0, %v15_v1  ;;  %v2753_v3 = vld [vmem:[%s3265_s1 + $0x20] sm:$0xff]  ;;  %2598 = vmatpush3.msra.mxu1 %v19_v0  ;;  %v18_v8 = vld [vmem:[%s3266_s0 + $0x38] sm:$0xff]  ;;  %v12_v10 = vld [vmem:[%s3266_s0 + $0x8] sm:$0xff] }
   0x4   :  { %2376 = vmatmul.mubr.msk.f32.vlgmr.msra.gmra.mxu1 %vm45_vm0, %v16_v2  ;;  %2381 = vmatprep.subr.mxu1 %v2719_v5  ;;  %v11_v7 = vld [vmem:[%s3266_s0] sm:$0xff]  ;;  %v2789_v11 = vld [vmem:[%s3265_s1 + $0x8] sm:$0xff]  ;;  %v13_v55 = vld [vmem:[%s3266_s0 + $0x10] sm:$0xff] }
   0x5   :  { %2382 = vmatpush3.msra.mxu1 %v2753_v3  ;;  %2378 = vmatprep.mubr.msk.f32.mxu1 %vm45_vm0, %v17_v4  ;;  %v2829_v16 = vld [vmem:[%s3265_s1 + $0x89] ss:$0 sm:$0xff]  ;;  %v2836_v22 = vld [vmem:[%s3265_s1 + $0x88] ss:$0 sm:$0xff]  ;;  %v14_v56 = vld [vmem:[%s3266_s0 + $0x18] sm:$0xff] }
   0x6   :  { %2383 = vmatprep.subr.mxu1 %v2719_v5  ;;  %2368 = vmatpush3.msra.mxu0 %v19_v0 }
   0x7   :  { %2384 = vmatpush3.msra.mxu1 %v2763_v6  ;;  %2369 = vmatprep.mubr.msk.f32.mxu0 %vm45_vm0, %v11_v7 }
   0x8   :  { %2379 = vmatmul.mubr.msk.f32.gmra.mxu1 %vm45_vm0, %v18_v8  ;;  %2385 = vmatprep.subr.mxu1 %v2719_v5 }
   0x9   :  { %2386 = vmatpush3.msra.mxu1 %v2777_v9  ;;  %2370 = vmatmul.mubr.msk.f32.vlgmr.msra.gmra.mxu0 %vm45_vm0, %v12_v10 }
   0xa   :  { %2387 = vmatprep.subr.mxu1 %v2719_v5  ;;  %2389 = vmatprep.mubr.msk.f32.mxu1 %vm2720_vm1, %v2719_v5 }
   0xb   :  { %2388 = vmatpush3.msra.mxu1 %v2789_v11  ;;  %2403 = vmatprep.subr.mxu0 %v2719_v5 }
   0xc   :  { %2390 = vmatmul.mubr.f32.vlgmr.msra.gmra.mxu1 %v2719_v5  ;;  %2392 = vmatprep.subr.mxu1 %v2719_v5 }
   0xd   :  { %2393 = vmatpush3.msra.mxu1 %v2753_v3  ;;  %2400 = vmatprep.mubr.msk.f32.mxu1 %vm2720_vm1, %v2719_v5 }
   0xe   :  { %2394 = vmatprep.subr.mxu1 %v2719_v5  ;;  %2404 = vmatpush3.msra.mxu0 %v2753_v3 }
   0xf   :  { %2395 = vmatpush3.msra.mxu1 %v2763_v6  ;;  %2405 = vmatprep.subr.mxu0 %v2719_v5 }
  0x10   :  { %2396 = vmatprep.subr.mxu1 %v2719_v5  ;;  %2406 = vmatpush3.msra.mxu0 %v2763_v6 }
  0x11   :  { %2397 = vmatpush3.msra.mxu1 %v2777_v9  ;;  %2407 = vmatprep.subr.mxu0 %v2719_v5 }
  0x12   :  { %2398 = vmatprep.subr.mxu1 %v2719_v5  ;;  %2408 = vmatpush3.msra.mxu0 %v2777_v9 }
  0x13   :  { %2399 = vmatpush3.msra.mxu1 %v2789_v11  ;;  %2409 = vmatprep.subr.mxu0 %v2719_v5 }
  0x14   :  { %2410 = vmatpush3.msra.mxu0 %v2789_v11  ;;  %2414 = vmatprep.subr.mxu1 %v2719_v5 }
  0x15   :  { %2425 = vmatprep.subr.mxu0 %v2719_v5  ;;  %2372 = vmatprep.mubr.msk.f32.mxu0 %vm45_vm0, %v13_v55 }
  0x16   :  { %2373 = vmatmul.mubr.msk.f32.gmra.mxu0 %vm45_vm0, %v14_v56 }
  0x17   :  { %2411 = vmatprep.mubr.msk.f32.mxu0 %vm2720_vm1, %v2719_v5 }
  0xc4   :  { %v2818_v12 = vpop.f32.mrf.mxu1 }
  0xc6   :  { %v2820_v13 = vpop.f32.mrf.mxu1 }
  0xc7   :  { %v157_v55 = vadd.f32 %v2836_v22, %v2820_v13 }
  0xc8   :  { %v2822_v14 = vpop.f32.mrf.mxu1 }
  0xc9   :  { %v2371_v20 = vpop.f32.mrf.mxu0 }
  0xca   :  { %v2824_v15 = vpop.f32.mrf.mxu1  ;;  %v142_v43 = vadd.f32 %v2371_v20, %v2836_v22 }
  0xcb   :  { %v136_v21 = vpop.f32.mrf.mxu0 }
  0xcc   :  { %v249_v17 = vpop.f32.mrf.mxu1  ;;  %v137_v23 = vadd.f32 %v2836_v22, %v136_v21 }
  0xcd   :  { %v250_v18 = vadd.f32 %v2829_v16, %v249_v17 }
  0xce   :  { %v2391_v19 = vpop.f32.mrf.mxu1 }
  0xcf   :  { %261 = vrot.lane.b32.xlu0 %v250_v18, %s2721_s5  ;;  %v253_v24 = vadd.f32 %v250_v18, %v137_v23 }
  0xd1   :  { %v2197_v25 = vmul.f32 -1.442695, %v253_v24 }
  0xd3   :  { %2605 = vpow2.f32 %v2197_v25 }
  0xd6   :  { %v2374_v62 = vpop.f32.mrf.mxu0 }
  0xd8   :  { %v146_v63 = vpop.f32.mrf.mxu0 }
  0xd9   :  { %v147_v4 = vadd.f32 %v2836_v22, %v146_v63 }
  0xe0   :  { %v2606_v26 = vpop.eup %2605 }
  0xe1   :  { %v257_v27 = vadd.f32 1.0, %v2606_v26 }
  0xe3   :  { %2607 = vrcp.f32 %v257_v27 }
  0xf0   :  { %v2608_v28 = vpop.eup %2607 }
 0x141   :  { %v262_v29 = vpop.permute.xlu0 %261 }
 0x142   :  { %v264_v30 = vmul.f32 %v2608_v28, %v262_v29 }
 0x144   :  { %266 = vrot.lane.b32.xlu0 %v264_v30, %s2721_s5 }
 0x1b6   :  { %v267_v31 = vpop.permute.xlu0 %266 }
 0x1b7   :  { %v269_v32 = vadd.f32 %v267_v31, %v137_v23 }
 0x1b9   :  { %2609 = vtanh.f32 %v269_v32 }
 0x1c6   :  { %v2610_v33 = vpop.eup %2609 }
 0x1c7   :  { %v271_v34 = vsub.f32 0.0, %v2610_v33 }
 0x1c9   :  { %273 = vrot.lane.b32.xlu1 %v271_v34, %s2722_s8  ;;  %v152_v34 = vadd.f32 %v2374_v62, %v2836_v22 }
 0x23b   :  { %v274_v35 = vpop.permute.xlu1 %273 }
 0x23c   :  { %v276_v36 = vmul.f32 %v2608_v28, %v274_v35 }
 0x23e   :  { %278 = vrot.lane.b32.xlu1 %v276_v36, %s2723_s9 }
 0x2b0   :  { %v279_v37 = vpop.permute.xlu1 %278 }
 0x2b1   :  { %v281_v38 = vadd.f32 %v2610_v33, %v279_v37 }
 0x2b3   :  { %283 = vrot.lane.b32.xlu0 %v281_v38, %s2721_s5 }
 0x325   :  { %v2843_v39 = vpop.permute.xlu0 %283 }
 0x326   :  { %2401 = vmatmul.mubr.msk.f32.vlgmr.msra.gmra.mxu1 %vm179_vm2, %v2843_v39 }
 0x327   :  { %2415 = vmatpush3.msra.mxu1 %v2753_v3  ;;  %2422 = vmatprep.mubr.msk.f32.mxu1 %vm2720_vm1, %v2719_v5 }
 0x328   :  { %2416 = vmatprep.subr.mxu1 %v2719_v5 }
 0x329   :  { %2417 = vmatpush3.msra.mxu1 %v2763_v6 }
 0x32a   :  { %2418 = vmatprep.subr.mxu1 %v2719_v5 }
 0x32b   :  { %2419 = vmatpush3.msra.mxu1 %v2777_v9 }
 0x32c   :  { %2420 = vmatprep.subr.mxu1 %v2719_v5 }
 0x32d   :  { %2421 = vmatpush3.msra.mxu1 %v2789_v11 }
 0x32e   :  { %2436 = vmatprep.subr.mxu1 %v2719_v5 }
 0x3e6   :  { %v353_v40 = vpop.f32.mrf.mxu1 }
 0x3e7   :  { %v354_v41 = vadd.f32 %v2829_v16, %v353_v40 }
 0x3e8   :  { %v2402_v42 = vpop.f32.mrf.mxu1 }
 0x3e9   :  { %365 = vrot.lane.b32.xlu1 %v354_v41, %s2721_s5  ;;  %v357_v44 = vadd.f32 %v354_v41, %v142_v43 }
 0x3eb   :  { %v2199_v45 = vmul.f32 -1.442695, %v357_v44 }
 0x3ed   :  { %2611 = vpow2.f32 %v2199_v45 }
 0x3fa   :  { %v2612_v46 = vpop.eup %2611 }
 0x3fb   :  { %v361_v47 = vadd.f32 1.0, %v2612_v46 }
 0x3fd   :  { %2613 = vrcp.f32 %v361_v47 }
 0x40a   :  { %v2614_v48 = vpop.eup %2613 }
 0x45b   :  { %v366_v49 = vpop.permute.xlu1 %365 }
 0x45c   :  { %v368_v50 = vmul.f32 %v2614_v48, %v366_v49 }
 0x45e   :  { %370 = vrot.lane.b32.xlu0 %v368_v50, %s2721_s5 }
 0x4d0   :  { %v371_v51 = vpop.permute.xlu0 %370 }
 0x4d1   :  { %v373_v52 = vadd.f32 %v371_v51, %v142_v43 }
 0x4d3   :  { %2615 = vtanh.f32 %v373_v52 }
 0x4e0   :  { %v2616_v53 = vpop.eup %2615 }
 0x4e1   :  { %v375_v54 = vsub.f32 %v281_v38, %v2616_v53 }
 0x4e3   :  { %377 = vrot.lane.b32.xlu1 %v375_v54, %s2722_s8 }
 0x555   :  { %v378_v57 = vpop.permute.xlu1 %377 }
 0x556   :  { %v380_v58 = vmul.f32 %v2614_v48, %v378_v57 }
 0x558   :  { %382 = vrot.lane.b32.xlu0 %v380_v58, %s2723_s9 }
 0x5ca   :  { %v383_v59 = vpop.permute.xlu0 %382 }
 0x5cb   :  { %v385_v60 = vadd.f32 %v2616_v53, %v383_v59 }
 0x5cd   :  { %387 = vrot.lane.b32.xlu1 %v385_v60, %s2721_s5 }
 0x63f   :  { %v2874_v61 = vpop.permute.xlu1 %387 }
 0x640   :  { %2412 = vmatmul.mubr.msk.f32.vlgmr.msra.gmra.mxu0 %vm179_vm2, %v2874_v61 }
 0x641   :  { %2426 = vmatpush3.msra.mxu0 %v2753_v3  ;;  %2433 = vmatprep.mubr.msk.f32.mxu0 %vm2720_vm1, %v2719_v5 }
 0x642   :  { %2427 = vmatprep.subr.mxu0 %v2719_v5 }
 0x643   :  { %2428 = vmatpush3.msra.mxu0 %v2763_v6 }
 0x644   :  { %2429 = vmatprep.subr.mxu0 %v2719_v5 }
 0x645   :  { %2430 = vmatpush3.msra.mxu0 %v2777_v9 }
 0x646   :  { %2431 = vmatprep.subr.mxu0 %v2719_v5 }
 0x647   :  { %2432 = vmatpush3.msra.mxu0 %v2789_v11 }
 0x648   :  { %2447 = vmatprep.subr.mxu0 %v2719_v5 }
 0x700   :  { %v457_v0 = vpop.f32.mrf.mxu0 }
 0x701   :  { %v458_v1 = vadd.f32 %v2829_v16, %v457_v0 }
 0x702   :  { %v2413_v2 = vpop.f32.mrf.mxu0 }
 0x703   :  { %469 = vrot.lane.b32.xlu0 %v458_v1, %s2721_s5  ;;  %v461_v7 = vadd.f32 %v458_v1, %v147_v4 }
 0x705   :  { %v2201_v8 = vmul.f32 -1.442695, %v461_v7 }
 0x707   :  { %2617 = vpow2.f32 %v2201_v8 }
 0x714   :  { %v2618_v10 = vpop.eup %2617 }
 0x715   :  { %v465_v17 = vadd.f32 1.0, %v2618_v10 }
 0x717   :  { %2619 = vrcp.f32 %v465_v17 }
 0x724   :  { %v2620_v18 = vpop.eup %2619 }
 0x775   :  { %v470_v19 = vpop.permute.xlu0 %469 }
 0x776   :  { %v472_v20 = vmul.f32 %v2620_v18, %v470_v19 }
 0x778   :  { %474 = vrot.lane.b32.xlu1 %v472_v20, %s2721_s5  ;;  %v162_v20 = vadd.f32 %v2818_v12, %v2836_v22  ;;  %v27_v12 = vld [vmem:[%s3265_s1 + $0x40] sm:$0xff] }
 0x7ea   :  { %v475_v21 = vpop.permute.xlu1 %474 }
 0x7eb   :  { %v477_v23 = vadd.f32 %v475_v21, %v147_v4 }
 0x7ed   :  { %2621 = vtanh.f32 %v477_v23 }
 0x7fa   :  { %v2622_v24 = vpop.eup %2621 }
 0x7fb   :  { %v479_v25 = vsub.f32 %v385_v60, %v2622_v24 }
 0x7fd   :  { %481 = vrot.lane.b32.xlu0 %v479_v25, %s2722_s8 }
 0x86f   :  { %v482_v26 = vpop.permute.xlu0 %481 }
 0x870   :  { %v484_v27 = vmul.f32 %v2620_v18, %v482_v26 }
 0x872   :  { %486 = vrot.lane.b32.xlu1 %v484_v27, %s2723_s9 }
 0x8e4   :  { %v487_v28 = vpop.permute.xlu1 %486 }
 0x8e5   :  { %v489_v29 = vadd.f32 %v2622_v24, %v487_v28 }
 0x8e7   :  { %491 = vrot.lane.b32.xlu0 %v489_v29, %s2721_s5 }
 0x959   :  { %v2895_v30 = vpop.permute.xlu0 %491 }
 0x95a   :  { %2423 = vmatmul.mubr.msk.f32.vlgmr.msra.gmra.mxu1 %vm179_vm2, %v2895_v30 }
 0x95b   :  { %2437 = vmatpush3.msra.mxu1 %v2753_v3  ;;  %2444 = vmatprep.mubr.msk.f32.mxu1 %vm2720_vm1, %v2719_v5 }
 0x95c   :  { %2438 = vmatprep.subr.mxu1 %v2719_v5 }
 0x95d   :  { %2439 = vmatpush3.msra.mxu1 %v2763_v6 }
 0x95e   :  { %2440 = vmatprep.subr.mxu1 %v2719_v5 }
 0x95f   :  { %2441 = vmatpush3.msra.mxu1 %v2777_v9 }
 0x960   :  { %2442 = vmatprep.subr.mxu1 %v2719_v5 }
 0x961   :  { %2443 = vmatpush3.msra.mxu1 %v2789_v11 }
 0x962   :  { %2458 = vmatprep.subr.mxu1 %v2719_v5 }
 0xa1a   :  { %v561_v31 = vpop.f32.mrf.mxu1 }
 0xa1b   :  { %v562_v32 = vadd.f32 %v2829_v16, %v561_v31 }
 0xa1c   :  { %v2424_v33 = vpop.f32.mrf.mxu1 }
 0xa1d   :  { %573 = vrot.lane.b32.xlu1 %v562_v32, %s2721_s5  ;;  %v565_v35 = vadd.f32 %v562_v32, %v152_v34 }
 0xa1f   :  { %v2203_v36 = vmul.f32 -1.442695, %v565_v35 }
 0xa21   :  { %2623 = vpow2.f32 %v2203_v36  ;;  %v26_v36 = vld [vmem:[%s3265_s1 + $0x38] sm:$0xff] }
 0xa2e   :  { %v2624_v37 = vpop.eup %2623 }
 0xa2f   :  { %v569_v38 = vadd.f32 1.0, %v2624_v37  ;;  %v25_v37 = vld [vmem:[%s3265_s1 + $0x30] sm:$0xff] }
 0xa31   :  { %2625 = vrcp.f32 %v569_v38  ;;  %v24_v38 = vld [vmem:[%s3265_s1 + $0x28] sm:$0xff] }
 0xa3e   :  { %v2626_v40 = vpop.eup %2625 }
 0xa8f   :  { %v574_v41 = vpop.permute.xlu1 %573 }
 0xa90   :  { %v576_v42 = vmul.f32 %v2626_v40, %v574_v41 }
 0xa92   :  { %578 = vrot.lane.b32.xlu0 %v576_v42, %s2721_s5 }
 0xb04   :  { %v579_v43 = vpop.permute.xlu0 %578 }
 0xb05   :  { %v581_v44 = vadd.f32 %v579_v43, %v152_v34 }
 0xb07   :  { %2627 = vtanh.f32 %v581_v44 }
 0xb14   :  { %v2628_v45 = vpop.eup %2627 }
 0xb15   :  { %v583_v46 = vsub.f32 %v489_v29, %v2628_v45 }
 0xb17   :  { %585 = vrot.lane.b32.xlu1 %v583_v46, %s2722_s8 }
 0xb89   :  { %v586_v47 = vpop.permute.xlu1 %585 }
 0xb8a   :  { %v588_v48 = vmul.f32 %v2626_v40, %v586_v47 }
 0xb8c   :  { %590 = vrot.lane.b32.xlu0 %v588_v48, %s2723_s9 }
 0xbfe   :  { %v591_v49 = vpop.permute.xlu0 %590 }
 0xbff   :  { %v593_v50 = vadd.f32 %v2628_v45, %v591_v49 }
 0xc01   :  { %595 = vrot.lane.b32.xlu1 %v593_v50, %s2721_s5 }
 0xc73   :  { %v2916_v51 = vpop.permute.xlu1 %595 }
 0xc74   :  { %2434 = vmatmul.mubr.msk.f32.vlgmr.msra.gmra.mxu0 %vm179_vm2, %v2916_v51 }
 0xc75   :  { %2448 = vmatpush3.msra.mxu0 %v2753_v3  ;;  %2455 = vmatprep.mubr.msk.f32.mxu0 %vm2720_vm1, %v2719_v5 }
 0xc76   :  { %2449 = vmatprep.subr.mxu0 %v2719_v5 }
 0xc77   :  { %2450 = vmatpush3.msra.mxu0 %v2763_v6 }
 0xc78   :  { %2451 = vmatprep.subr.mxu0 %v2719_v5 }
 0xc79   :  { %2452 = vmatpush3.msra.mxu0 %v2777_v9 }
 0xc7a   :  { %2453 = vmatprep.subr.mxu0 %v2719_v5 }
 0xc7b   :  { %2454 = vmatpush3.msra.mxu0 %v2789_v11 }
 0xc7c   :  { %2469 = vmatprep.subr.mxu0 %v27_v12 }
 0xd34   :  { %v665_v52 = vpop.f32.mrf.mxu0 }
 0xd35   :  { %v666_v53 = vadd.f32 %v2829_v16, %v665_v52 }
 0xd36   :  { %v2435_v54 = vpop.f32.mrf.mxu0 }
 0xd37   :  { %677 = vrot.lane.b32.xlu0 %v666_v53, %s2721_s5  ;;  %v669_v56 = vadd.f32 %v666_v53, %v157_v55  ;;  %v2990_v53 = vld [vmem:[%s3265_s1 + $0x60] sm:$0xff]  ;;  %v2996_v54 = vld [vmem:[%s3265_s1 + $0x58] sm:$0xff] }
 0xd39   :  { %v2205_v57 = vmul.f32 -1.442695, %v669_v56  ;;  %v3010_v56 = vld [vmem:[%s3265_s1 + $0x48] sm:$0xff] }
 0xd3b   :  { %2629 = vpow2.f32 %v2205_v57 }
 0xd48   :  { %v2630_v58 = vpop.eup %2629 }
 0xd49   :  { %v673_v59 = vadd.f32 1.0, %v2630_v58 }
 0xd4b   :  { %2631 = vrcp.f32 %v673_v59 }
 0xd58   :  { %v2632_v60 = vpop.eup %2631 }
 0xda9   :  { %v678_v62 = vpop.permute.xlu0 %677 }
 0xdaa   :  { %v680_v63 = vmul.f32 %v2632_v60, %v678_v62 }
 0xdac   :  { %682 = vrot.lane.b32.xlu1 %v680_v63, %s2721_s5  ;;  %v3045_v63 = vld [vmem:[%s3265_s1 + $0x8b] ss:$0 sm:$0xff] }
 0xe1e   :  { %v683_v0 = vpop.permute.xlu1 %682 }
 0xe1f   :  { %v685_v1 = vadd.f32 %v683_v0, %v157_v55  ;;  %v3003_v55 = vld [vmem:[%s3265_s1 + $0x50] sm:$0xff] }
 0xe21   :  { %2633 = vtanh.f32 %v685_v1 }
 0xe2e   :  { %v2634_v2 = vpop.eup %2633 }
 0xe2f   :  { %v687_v4 = vsub.f32 %v593_v50, %v2634_v2 }
 0xe31   :  { %689 = vrot.lane.b32.xlu0 %v687_v4, %s2722_s8 }
 0xea3   :  { %v690_v7 = vpop.permute.xlu0 %689 }
 0xea4   :  { %v692_v13 = vmul.f32 %v2632_v60, %v690_v7 }
 0xea6   :  { %694 = vrot.lane.b32.xlu1 %v692_v13, %s2723_s9  ;;  %v3054_v13 = vld [vmem:[%s3265_s1 + $0x8a] ss:$0 sm:$0xff] }
 0xf18   :  { %v695_v8 = vpop.permute.xlu1 %694 }
 0xf19   :  { %v697_v10 = vadd.f32 %v2634_v2, %v695_v8 }
 0xf1b   :  { %699 = vrot.lane.b32.xlu0 %v697_v10, %s2721_s5 }
 0xf8d   :  { %v700_v17 = vpop.permute.xlu0 %699 }
 0xf8e   :  { %2445 = vmatmul.mubr.msk.f32.vlgmr.msra.gmra.mxu1 %vm179_vm2, %v700_v17 }
 0xf8f   :  { %2459 = vmatpush3.msra.mxu1 %v2753_v3  ;;  %2466 = vmatprep.mubr.msk.f32.mxu1 %vm2720_vm1, %v2719_v5 }
 0xf90   :  { %2460 = vmatprep.subr.mxu1 %v2719_v5 }
 0xf91   :  { %2461 = vmatpush3.msra.mxu1 %v2763_v6 }
 0xf92   :  { %2462 = vmatprep.subr.mxu1 %v2719_v5 }
 0xf93   :  { %2463 = vmatpush3.msra.mxu1 %v2777_v9 }
 0xf94   :  { %2464 = vmatprep.subr.mxu1 %v2719_v5 }
 0xf95   :  { %2465 = vmatpush3.msra.mxu1 %v2789_v11 }
 0xf96   :  { %2489 = vmatprep.subr.mxu1 %v2719_v5 }
0x104e   :  { %v769_v18 = vpop.f32.mrf.mxu1 }
0x104f   :  { %v770_v3 = vadd.f32 %v2829_v16, %v769_v18 }
0x1050   :  { %v2446_v19 = vpop.f32.mrf.mxu1 }
0x1051   :  { %781 = vrot.lane.b32.xlu1 %v770_v3, %s2721_s5  ;;  %v773_v6 = vadd.f32 %v770_v3, %v162_v20 }
0x1053   :  { %v2207_v21 = vmul.f32 -1.442695, %v773_v6 }
0x1055   :  { %2635 = vpow2.f32 %v2207_v21 }
0x1062   :  { %v2636_v23 = vpop.eup %2635 }
0x1063   :  { %v777_v9 = vadd.f32 1.0, %v2636_v23 }
0x1065   :  { %2637 = vrcp.f32 %v777_v9 }
0x1072   :  { %v2638_v24 = vpop.eup %2637 }
0x10c3   :  { %v782_v25 = vpop.permute.xlu1 %781 }
0x10c4   :  { %v784_v11 = vmul.f32 %v2638_v24, %v782_v25 }
0x10c6   :  { %786 = vrot.lane.b32.xlu0 %v784_v11, %s2721_s5 }
0x1138   :  { %v787_v26 = vpop.permute.xlu0 %786 }
0x1139   :  { %v789_v27 = vadd.f32 %v787_v26, %v162_v20 }
0x113b   :  { %2639 = vtanh.f32 %v789_v27  ;;  %v172_v27 = vadd.f32 %v2822_v14, %v2836_v22 }
0x1148   :  { %v2640_v28 = vpop.eup %2639 }
0x1149   :  { %v791_v29 = vsub.f32 %v697_v10, %v2640_v28 }
0x114b   :  { %793 = vrot.lane.b32.xlu1 %v791_v29, %s2722_s8 }
0x11bd   :  { %v794_v31 = vpop.permute.xlu1 %793 }
0x11be   :  { %v796_v32 = vmul.f32 %v2638_v24, %v794_v31 }
0x11c0   :  { %798 = vrot.lane.b32.xlu0 %v796_v32, %s2723_s9 }
0x1232   :  { %v799_v33 = vpop.permute.xlu0 %798 }
0x1233   :  { %v801_v34 = vadd.f32 %v2640_v28, %v799_v33 }
0x1235   :  { %803 = vrot.lane.b32.xlu1 %v801_v34, %s2721_s5 }
0x12a7   :  { %v804_v35 = vpop.permute.xlu1 %803 }
0x12a8   :  { %2456 = vmatmul.mubr.msk.f32.vlgmr.msra.gmra.mxu0 %vm179_vm2, %v804_v35 }
0x12a9   :  { %2470 = vmatpush3.msra.mxu0 %v27_v12  ;;  %2477 = vmatprep.mubr.msk.f32.mxu0 %vm179_vm2, %v2843_v39 }
0x12aa   :  { %2471 = vmatprep.subr.mxu0 %v26_v36 }
0x12ab   :  { %2472 = vmatpush3.msra.mxu0 %v26_v36 }
0x12ac   :  { %2473 = vmatprep.subr.mxu0 %v25_v37 }
0x12ad   :  { %2474 = vmatpush3.msra.mxu0 %v25_v37 }
0x12ae   :  { %2475 = vmatprep.subr.mxu0 %v24_v38 }
0x12af   :  { %2476 = vmatpush3.msra.mxu0 %v24_v38 }
0x12b0   :  { %2478 = vmatmul.mubr.msk.f32.vlgmr.msra.gmra.mxu0 %vm179_vm2, %v2874_v61  ;;  %2511 = vmatprep.subr.mxu0 %v2719_v5  ;;  %v167_v61 = vadd.f32 %v2836_v22, %v2824_v15 }
0x12b1   :  { %2480 = vmatprep.mubr.msk.f32.mxu0 %vm179_vm2, %v2895_v30  ;;  %2512 = vmatpush3.msra.mxu0 %v2990_v53 }
0x12b2   :  { %2513 = vmatprep.subr.mxu0 %v2719_v5 }
0x12b3   :  { %2514 = vmatpush3.msra.mxu0 %v2996_v54 }
0x12b4   :  { %2481 = vmatmul.mubr.msk.f32.gmra.mxu0 %vm179_vm2, %v2916_v51  ;;  %2515 = vmatprep.subr.mxu0 %v2719_v5 }
0x12b5   :  { %2483 = vmatprep.mubr.msk.f32.mxu0 %vm179_vm2, %v700_v17  ;;  %2516 = vmatpush3.msra.mxu0 %v3003_v55 }
0x12b6   :  { %2517 = vmatprep.subr.mxu0 %v2719_v5 }
0x12b7   :  { %2518 = vmatpush3.msra.mxu0 %v3010_v56 }
0x12b8   :  { %2484 = vmatmul.mubr.msk.f32.gmra.mxu0 %vm179_vm2, %v804_v35  ;;  %2533 = vmatprep.subr.mxu0 %v2719_v5 }
0x1368   :  { %v873_v39 = vpop.f32.mrf.mxu0 }
0x1369   :  { %v874_v40 = vadd.f32 %v2829_v16, %v873_v39 }
0x136a   :  { %v2457_v41 = vpop.f32.mrf.mxu0 }
0x136b   :  { %885 = vrot.lane.b32.xlu0 %v874_v40, %s2721_s5  ;;  %v877_v42 = vadd.f32 %v874_v40, %v167_v61 }
0x136d   :  { %v2209_v43 = vmul.f32 -1.442695, %v877_v42 }
0x136f   :  { %2641 = vpow2.f32 %v2209_v43 }
0x1370   :  { %v3049_v4 = vpop.f32.mrf.mxu0 }
0x1372   :  { %v1085_v7 = vpop.f32.mrf.mxu0 }
0x1373   :  { %v1086_v8 = vadd.f32 %v3054_v13, %v1085_v7 }
0x137c   :  { %v2642_v30 = vpop.eup %2641 }
0x137d   :  { %v881_v44 = vadd.f32 1.0, %v2642_v30 }
0x137f   :  { %2643 = vrcp.f32 %v881_v44  ;;  %v1091_v44 = vadd.f32 %v3049_v4, %v3054_v13  ;;  %v2482_v4 = vpop.f32.mrf.mxu0 }
0x1381   :  { %v1095_v7 = vpop.f32.mrf.mxu0 }
0x138c   :  { %v2644_v45 = vpop.eup %2643 }
0x13dd   :  { %v886_v46 = vpop.permute.xlu0 %885 }
0x13de   :  { %v888_v47 = vmul.f32 %v2644_v45, %v886_v46 }
0x13e0   :  { %890 = vrot.lane.b32.xlu1 %v888_v47, %s2721_s5 }
0x1452   :  { %v891_v48 = vpop.permute.xlu1 %890 }
0x1453   :  { %v893_v49 = vadd.f32 %v891_v48, %v167_v61 }
0x1455   :  { %2645 = vtanh.f32 %v893_v49 }
0x1462   :  { %v2646_v50 = vpop.eup %2645 }
0x1463   :  { %v895_v51 = vsub.f32 %v801_v34, %v2646_v50 }
0x1465   :  { %897 = vrot.lane.b32.xlu0 %v895_v51, %s2722_s8 }
0x14d7   :  { %v898_v52 = vpop.permute.xlu0 %897 }
0x14d8   :  { %v900_v15 = vmul.f32 %v2644_v45, %v898_v52 }
0x14da   :  { %902 = vrot.lane.b32.xlu1 %v900_v15, %s2723_s9 }
0x154c   :  { %v903_v57 = vpop.permute.xlu1 %902 }
0x154d   :  { %v3015_v58 = vadd.f32 %v2646_v50, %v903_v57 }
0x154f   :  { %907 = vrot.lane.b32.xlu0 %v3015_v58, %s2721_s5 }
0x15c1   :  { %v908_v59 = vpop.permute.xlu0 %907 }
0x15c2   :  { %2467 = vmatmul.mubr.msk.f32.vlgmr.msra.gmra.mxu1 %vm179_vm2, %v908_v59  ;;  %2486 = vmatprep.mubr.msk.f32.mxu0 %vm179_vm2, %v908_v59 }
0x15c3   :  { %2490 = vmatpush3.msra.mxu1 %v2990_v53  ;;  %2497 = vmatprep.mubr.msk.f32.mxu1 %vm2720_vm1, %v2719_v5 }
0x15c4   :  { %2491 = vmatprep.subr.mxu1 %v2719_v5 }
0x15c5   :  { %2492 = vmatpush3.msra.mxu1 %v2996_v54 }
0x15c6   :  { %2493 = vmatprep.subr.mxu1 %v2719_v5 }
0x15c7   :  { %2494 = vmatpush3.msra.mxu1 %v3003_v55 }
0x15c8   :  { %2495 = vmatprep.subr.mxu1 %v2719_v5 }
0x15c9   :  { %2496 = vmatpush3.msra.mxu1 %v3010_v56 }
0x15ca   :  { %2498 = vmatmul.mubr.f32.vlgmr.msra.gmra.mxu1 %v2719_v5  ;;  %2500 = vmatprep.subr.mxu1 %v2719_v5 }
0x15cb   :  { %2501 = vmatpush3.msra.mxu1 %v2990_v53  ;;  %2508 = vmatprep.mubr.msk.f32.mxu1 %vm2720_vm1, %v2719_v5 }
0x15cc   :  { %2502 = vmatprep.subr.mxu1 %v2719_v5 }
0x15cd   :  { %2503 = vmatpush3.msra.mxu1 %v2996_v54 }
0x15ce   :  { %2504 = vmatprep.subr.mxu1 %v2719_v5 }
0x15cf   :  { %2505 = vmatpush3.msra.mxu1 %v3003_v55 }
0x15d0   :  { %2506 = vmatprep.subr.mxu1 %v2719_v5 }
0x15d1   :  { %2507 = vmatpush3.msra.mxu1 %v3010_v56 }
0x15d2   :  { %2522 = vmatprep.subr.mxu1 %v2719_v5 }
0x1682   :  { %v977_v60 = vpop.f32.mrf.mxu1 }
0x1683   :  { %v978_v26 = vadd.f32 %v2829_v16, %v977_v60 }
0x1684   :  { %v2468_v62 = vpop.f32.mrf.mxu1 }
0x1685   :  { %v981_v28 = vadd.f32 %v978_v26, %v172_v27 }
0x1687   :  { %v2211_v29 = vmul.f32 -1.442695, %v981_v28 }
0x168a   :  { %v1194_v0 = vpop.f32.mrf.mxu1 }
0x168b   :  { %v1195_v1 = vadd.f32 %v3045_v63, %v1194_v0 }
0x168c   :  { %v2499_v2 = vpop.f32.mrf.mxu1 }
0x168d   :  { %1206 = vrot.lane.b32.xlu1 %v1195_v1, %s2721_s5  ;;  %v1198_v10 = vadd.f32 %v1195_v1, %v1086_v8 }
0x168f   :  { %v2222_v17 = vmul.f32 -1.442695, %v1198_v10 }
0x1691   :  { %2647 = vpow2.f32 %v2222_v17 }
0x169e   :  { %v2648_v18 = vpop.eup %2647 }
0x169f   :  { %v1202_v3 = vadd.f32 1.0, %v2648_v18 }
0x16a1   :  { %2649 = vrcp.f32 %v1202_v3 }
0x16ae   :  { %v2650_v19 = vpop.eup %2649 }
0x16ff   :  { %v1207_v20 = vpop.permute.xlu1 %1206 }
0x1700   :  { %v1209_v6 = vmul.f32 %v2650_v19, %v1207_v20 }
0x1702   :  { %1211 = vrot.lane.b32.xlu0 %v1209_v6, %s2721_s5  ;;  %v1096_v6 = vadd.f32 %v3054_v13, %v1095_v7 }
0x1774   :  { %v1212_v21 = vpop.permute.xlu0 %1211 }
0x1775   :  { %v1214_v23 = vadd.f32 %v1212_v21, %v1086_v8  ;;  %v3109_v8 = vpop.f32.mrf.mxu0 }
0x1777   :  { %2651 = vtanh.f32 %v1214_v23  ;;  %v3111_v10 = vpop.f32.mrf.mxu0 }
0x1778   :  { %2653 = vpow2.f32 %v2211_v29 }
0x1784   :  { %v2652_v9 = vpop.eup %2651 }
0x1785   :  { %v1216_v24 = vsub.f32 0.0, %v2652_v9  ;;  %v2654_v12 = vpop.eup %2653 }
0x1786   :  { %v985_v31 = vadd.f32 1.0, %v2654_v12 }
0x1787   :  { %1218 = vrot.lane.b32.xlu1 %v1216_v24, %s2722_s8 }
0x1788   :  { %2655 = vrcp.f32 %v985_v31 }
0x1795   :  { %v2656_v34 = vpop.eup %2655 }
0x17f9   :  { %v1219_v25 = vpop.permute.xlu1 %1218 }
0x17fa   :  { %v1221_v11 = vmul.f32 %v2650_v19, %v1219_v25 }
0x17fc   :  { %1223 = vrot.lane.b32.xlu0 %v1221_v11, %s2723_s9 }
0x1800   :  { %989 = vrot.lane.b32.xlu0 %v978_v26, %s2721_s5 }
0x186e   :  { %v1224_v32 = vpop.permute.xlu0 %1223 }
0x186f   :  { %v1226_v33 = vadd.f32 %v2652_v9, %v1224_v32 }
0x1871   :  { %1228 = vrot.lane.b32.xlu1 %v1226_v33, %s2721_s5 }
0x1872   :  { %v990_v35 = vpop.permute.xlu0 %989 }
0x1873   :  { %v992_v36 = vmul.f32 %v2656_v34, %v990_v35 }
0x1875   :  { %994 = vrot.lane.b32.xlu0 %v992_v36, %s2721_s5 }
0x18e3   :  { %v3066_v16 = vpop.permute.xlu1 %1228 }
0x18e4   :  { %2509 = vmatmul.mubr.msk.f32.vlgmr.msra.gmra.mxu1 %vm179_vm2, %v3066_v16 }
0x18e5   :  { %2523 = vmatpush3.msra.mxu1 %v2990_v53  ;;  %2530 = vmatprep.mubr.msk.f32.mxu1 %vm2720_vm1, %v2719_v5 }
0x18e6   :  { %2524 = vmatprep.subr.mxu1 %v2719_v5 }
0x18e7   :  { %v995_v14 = vpop.permute.xlu0 %994  ;;  %2525 = vmatpush3.msra.mxu1 %v2996_v54 }
0x18e8   :  { %v997_v22 = vadd.f32 %v995_v14, %v172_v27  ;;  %2526 = vmatprep.subr.mxu1 %v2719_v5 }
0x18e9   :  { %2527 = vmatpush3.msra.mxu1 %v3003_v55 }
0x18ea   :  { %2657 = vtanh.f32 %v997_v22  ;;  %2528 = vmatprep.subr.mxu1 %v2719_v5 }
0x18eb   :  { %2529 = vmatpush3.msra.mxu1 %v3010_v56 }
0x18ec   :  { %2544 = vmatprep.subr.mxu1 %v2719_v5 }
0x18f7   :  { %v2658_v37 = vpop.eup %2657 }
0x18f8   :  { %v999_v38 = vsub.f32 %v3015_v58, %v2658_v37 }
0x18fa   :  { %1001 = vrot.lane.b32.xlu0 %v999_v38, %s2722_s8 }
0x196c   :  { %v1002_v39 = vpop.permute.xlu0 %1001 }
0x196d   :  { %v1004_v40 = vmul.f32 %v2656_v34, %v1002_v39 }
0x196f   :  { %1006 = vrot.lane.b32.xlu0 %v1004_v40, %s2723_s9 }
0x19a4   :  { %v1298_v41 = vpop.f32.mrf.mxu1 }
0x19a5   :  { %v1299_v61 = vadd.f32 %v3045_v63, %v1298_v41 }
0x19a6   :  { %v2510_v42 = vpop.f32.mrf.mxu1 }
0x19a7   :  { %1310 = vrot.lane.b32.xlu1 %v1299_v61, %s2721_s5  ;;  %v1302_v45 = vadd.f32 %v1299_v61, %v1091_v44 }
0x19a9   :  { %v2224_v46 = vmul.f32 -1.442695, %v1302_v45 }
0x19ab   :  { %2659 = vpow2.f32 %v2224_v46 }
0x19b8   :  { %v2660_v47 = vpop.eup %2659 }
0x19b9   :  { %v1306_v48 = vadd.f32 1.0, %v2660_v47 }
0x19bb   :  { %2661 = vrcp.f32 %v1306_v48 }
0x19c8   :  { %v2662_v49 = vpop.eup %2661 }
0x19e1   :  { %v1007_v43 = vpop.permute.xlu0 %1006 }
0x19e2   :  { %v1009_v30 = vadd.f32 %v2658_v37, %v1007_v43  ;;  %v1101_v37 = vadd.f32 %v2482_v4, %v3054_v13 }
0x19e4   :  { %1015 = vrot.lane.b32.xlu0 %v1009_v30, %s2721_s5 }
0x1a19   :  { %v1311_v50 = vpop.permute.xlu1 %1310 }
0x1a1a   :  { %v1313_v51 = vmul.f32 %v2662_v49, %v1311_v50 }
0x1a1c   :  { %1315 = vrot.lane.b32.xlu1 %v1313_v51, %s2721_s5 }
0x1a56   :  { %v1016_v52 = vpop.permute.xlu0 %1015 }
0x1a57   :  { %2487 = vmatmul.mubr.msk.f32.gmra.mxu0 %vm179_vm2, %v1016_v52 }
0x1a58   :  { %2519 = vmatprep.mubr.msk.f32.mxu0 %vm2720_vm1, %v2719_v5 }
0x1a8e   :  { %v1316_v15 = vpop.permute.xlu1 %1315 }
0x1a8f   :  { %v1318_v57 = vadd.f32 %v1316_v15, %v1091_v44 }
0x1a91   :  { %2663 = vtanh.f32 %v1318_v57 }
0x1a9e   :  { %v2664_v58 = vpop.eup %2663 }
0x1a9f   :  { %v1320_v59 = vsub.f32 %v1226_v33, %v2664_v58 }
0x1aa1   :  { %1322 = vrot.lane.b32.xlu1 %v1320_v59, %s2722_s8 }
0x1b13   :  { %v1323_v60 = vpop.permute.xlu1 %1322 }
0x1b14   :  { %v1325_v62 = vmul.f32 %v2662_v49, %v1323_v60 }
0x1b16   :  { %1327 = vrot.lane.b32.xlu1 %v1325_v62, %s2723_s9 }
0x1b17   :  { %v3113_v17 = vpop.f32.mrf.mxu0 }
0x1b19   :  { %v3115_v18 = vpop.f32.mrf.mxu0 }
0x1b88   :  { %v1328_v0 = vpop.permute.xlu1 %1327 }
0x1b89   :  { %v1330_v1 = vadd.f32 %v2664_v58, %v1328_v0  ;;  %v1106_v58 = vadd.f32 %v3054_v13, %v3111_v10 }
0x1b8b   :  { %1332 = vrot.lane.b32.xlu1 %v1330_v1, %s2721_s5 }
0x1bfd   :  { %v3095_v2 = vpop.permute.xlu1 %1332 }
0x1bfe   :  { %2520 = vmatmul.mubr.msk.f32.vlgmr.msra.gmra.mxu0 %vm179_vm2, %v3095_v2 }
0x1bff   :  { %2534 = vmatpush3.msra.mxu0 %v2990_v53  ;;  %2541 = vmatprep.mubr.msk.f32.mxu0 %vm2720_vm1, %v2719_v5 }
0x1c00   :  { %2535 = vmatprep.subr.mxu0 %v2719_v5 }
0x1c01   :  { %2536 = vmatpush3.msra.mxu0 %v2996_v54 }
0x1c02   :  { %2537 = vmatprep.subr.mxu0 %v2719_v5 }
0x1c03   :  { %2538 = vmatpush3.msra.mxu0 %v3003_v55 }
0x1c04   :  { %2539 = vmatprep.subr.mxu0 %v2719_v5 }
0x1c05   :  { %2540 = vmatpush3.msra.mxu0 %v3010_v56 }
0x1c06   :  { %2555 = vmatprep.subr.mxu0 %v2719_v5 }
0x1cbe   :  { %v1402_v3 = vpop.f32.mrf.mxu0 }
0x1cbf   :  { %v1403_v19 = vadd.f32 %v3045_v63, %v1402_v3 }
0x1cc0   :  { %v2521_v20 = vpop.f32.mrf.mxu0 }
0x1cc1   :  { %1414 = vrot.lane.b32.xlu0 %v1403_v19, %s2721_s5  ;;  %v1406_v21 = vadd.f32 %v1403_v19, %v1096_v6 }
0x1cc3   :  { %v2226_v23 = vmul.f32 -1.442695, %v1406_v21 }
0x1cc5   :  { %2665 = vpow2.f32 %v2226_v23 }
0x1cd2   :  { %v2666_v9 = vpop.eup %2665 }
0x1cd3   :  { %v1410_v24 = vadd.f32 1.0, %v2666_v9 }
0x1cd5   :  { %2667 = vrcp.f32 %v1410_v24 }
0x1ce2   :  { %v2668_v25 = vpop.eup %2667 }
0x1d33   :  { %v1415_v11 = vpop.permute.xlu0 %1414 }
0x1d34   :  { %v1417_v26 = vmul.f32 %v2668_v25, %v1415_v11 }
0x1d36   :  { %1419 = vrot.lane.b32.xlu1 %v1417_v26, %s2721_s5 }
0x1da8   :  { %v1420_v27 = vpop.permute.xlu1 %1419 }
0x1da9   :  { %v1422_v28 = vadd.f32 %v1420_v27, %v1096_v6 }
0x1dab   :  { %2669 = vtanh.f32 %v1422_v28 }
0x1db8   :  { %v2670_v29 = vpop.eup %2669 }
0x1db9   :  { %v1424_v12 = vsub.f32 %v1330_v1, %v2670_v29 }
0x1dbb   :  { %1426 = vrot.lane.b32.xlu0 %v1424_v12, %s2722_s8 }
0x1e2d   :  { %v1427_v31 = vpop.permute.xlu0 %1426 }
0x1e2e   :  { %v1429_v32 = vmul.f32 %v2668_v25, %v1427_v31 }
0x1e30   :  { %1431 = vrot.lane.b32.xlu1 %v1429_v32, %s2723_s9 }
0x1ea2   :  { %v1432_v33 = vpop.permute.xlu1 %1431 }
0x1ea3   :  { %v1434_v34 = vadd.f32 %v2670_v29, %v1432_v33 }
0x1ea5   :  { %1436 = vrot.lane.b32.xlu0 %v1434_v34, %s2721_s5 }
0x1f17   :  { %v3124_v35 = vpop.permute.xlu0 %1436 }
0x1f18   :  { %2531 = vmatmul.mubr.msk.f32.vlgmr.msra.gmra.mxu1 %vm179_vm2, %v3124_v35 }
0x1f19   :  { %2545 = vmatpush3.msra.mxu1 %v2990_v53  ;;  %2552 = vmatprep.mubr.msk.f32.mxu1 %vm2720_vm1, %v2719_v5 }
0x1f1a   :  { %2546 = vmatprep.subr.mxu1 %v2719_v5 }
0x1f1b   :  { %2547 = vmatpush3.msra.mxu1 %v2996_v54 }
0x1f1c   :  { %2548 = vmatprep.subr.mxu1 %v2719_v5 }
0x1f1d   :  { %2549 = vmatpush3.msra.mxu1 %v3003_v55 }
0x1f1e   :  { %2550 = vmatprep.subr.mxu1 %v2719_v5 }
0x1f1f   :  { %2551 = vmatpush3.msra.mxu1 %v3010_v56 }
0x1f20   :  { %2566 = vmatprep.subr.mxu1 %v2719_v5 }
0x1fd8   :  { %v1506_v36 = vpop.f32.mrf.mxu1 }
0x1fd9   :  { %v1507_v14 = vadd.f32 %v3045_v63, %v1506_v36 }
0x1fda   :  { %v2532_v22 = vpop.f32.mrf.mxu1 }
0x1fdb   :  { %1518 = vrot.lane.b32.xlu1 %v1507_v14, %s2721_s5  ;;  %v1510_v38 = vadd.f32 %v1507_v14, %v1101_v37 }
0x1fdd   :  { %v2228_v39 = vmul.f32 -1.442695, %v1510_v38  ;;  %v34_v38 = vld [vmem:[%s3265_s1 + $0x78] sm:$0xff] }
0x1fdf   :  { %2671 = vpow2.f32 %v2228_v39  ;;  %v33_v39 = vld [vmem:[%s3265_s1 + $0x70] sm:$0xff] }
0x1fec   :  { %v2672_v40 = vpop.eup %2671 }
0x1fed   :  { %v1514_v41 = vadd.f32 1.0, %v2672_v40  ;;  %v32_v40 = vld [vmem:[%s3265_s1 + $0x68] sm:$0xff] }
0x1fef   :  { %2673 = vrcp.f32 %v1514_v41 }
0x1ffc   :  { %v2674_v61 = vpop.eup %2673 }
0x204d   :  { %v1519_v42 = vpop.permute.xlu1 %1518 }
0x204e   :  { %v1521_v43 = vmul.f32 %v2674_v61, %v1519_v42  ;;  %v1116_v42 = vadd.f32 %v3054_v13, %v3115_v18 }
0x2050   :  { %1523 = vrot.lane.b32.xlu0 %v1521_v43, %s2721_s5 }
0x20c2   :  { %v1524_v30 = vpop.permute.xlu0 %1523 }
0x20c3   :  { %v1526_v44 = vadd.f32 %v1524_v30, %v1101_v37 }
0x20c5   :  { %2675 = vtanh.f32 %v1526_v44 }
0x20d2   :  { %v2676_v45 = vpop.eup %2675 }
0x20d3   :  { %v1528_v46 = vsub.f32 %v1434_v34, %v2676_v45 }
0x20d5   :  { %1530 = vrot.lane.b32.xlu1 %v1528_v46, %s2722_s8 }
0x2147   :  { %v1531_v47 = vpop.permute.xlu1 %1530 }
0x2148   :  { %v1533_v48 = vmul.f32 %v2674_v61, %v1531_v47 }
0x214a   :  { %1535 = vrot.lane.b32.xlu0 %v1533_v48, %s2723_s9 }
0x21bc   :  { %v1536_v49 = vpop.permute.xlu0 %1535 }
0x21bd   :  { %v1538_v50 = vadd.f32 %v2676_v45, %v1536_v49 }
0x21bf   :  { %1540 = vrot.lane.b32.xlu1 %v1538_v50, %s2721_s5 }
0x2231   :  { %v3145_v51 = vpop.permute.xlu1 %1540 }
0x2232   :  { %2542 = vmatmul.mubr.msk.f32.vlgmr.msra.gmra.mxu0 %vm179_vm2, %v3145_v51 }
0x2233   :  { %2556 = vmatpush3.msra.mxu0 %v2990_v53  ;;  %2563 = vmatprep.mubr.msk.f32.mxu0 %vm2720_vm1, %v2719_v5 }
0x2234   :  { %2557 = vmatprep.subr.mxu0 %v2719_v5 }
0x2235   :  { %2558 = vmatpush3.msra.mxu0 %v2996_v54 }
0x2236   :  { %2559 = vmatprep.subr.mxu0 %v2719_v5 }
0x2237   :  { %2560 = vmatpush3.msra.mxu0 %v3003_v55 }
0x2238   :  { %2561 = vmatprep.subr.mxu0 %v2719_v5 }
0x2239   :  { %2562 = vmatpush3.msra.mxu0 %v3010_v56 }
0x22f2   :  { %v1610_v52 = vpop.f32.mrf.mxu0 }
0x22f3   :  { %v1611_v15 = vadd.f32 %v3045_v63, %v1610_v52 }
0x22f4   :  { %v2543_v57 = vpop.f32.mrf.mxu0 }
0x22f5   :  { %1622 = vrot.lane.b32.xlu0 %v1611_v15, %s2721_s5  ;;  %v1614_v59 = vadd.f32 %v1611_v15, %v1106_v58 }
0x22f7   :  { %v2230_v60 = vmul.f32 -1.442695, %v1614_v59 }
0x22f9   :  { %2677 = vpow2.f32 %v2230_v60 }
0x2306   :  { %v2678_v62 = vpop.eup %2677 }
0x2307   :  { %v1618_v0 = vadd.f32 1.0, %v2678_v62  ;;  %v1121_v62 = vadd.f32 %v3113_v17, %v3054_v13 }
0x2309   :  { %2679 = vrcp.f32 %v1618_v0 }
0x2316   :  { %v2680_v1 = vpop.eup %2679 }
0x2367   :  { %v1623_v4 = vpop.permute.xlu0 %1622 }
0x2368   :  { %v1625_v7 = vmul.f32 %v2680_v1, %v1623_v4 }
0x236a   :  { %1627 = vrot.lane.b32.xlu1 %v1625_v7, %s2721_s5 }
0x23dc   :  { %v1628_v3 = vpop.permute.xlu1 %1627 }
0x23dd   :  { %v1630_v19 = vadd.f32 %v1628_v3, %v1106_v58 }
0x23df   :  { %2681 = vtanh.f32 %v1630_v19 }
0x23ec   :  { %v2682_v20 = vpop.eup %2681 }
0x23ed   :  { %v1632_v6 = vsub.f32 %v1538_v50, %v2682_v20 }
0x23ef   :  { %1634 = vrot.lane.b32.xlu0 %v1632_v6, %s2722_s8 }
0x2461   :  { %v1635_v21 = vpop.permute.xlu0 %1634 }
0x2462   :  { %v1637_v10 = vmul.f32 %v2680_v1, %v1635_v21 }
0x2464   :  { %1639 = vrot.lane.b32.xlu1 %v1637_v10, %s2723_s9 }
0x24d6   :  { %v1640_v23 = vpop.permute.xlu1 %1639 }
0x24d7   :  { %v1642_v9 = vadd.f32 %v2682_v20, %v1640_v23 }
0x24d9   :  { %1644 = vrot.lane.b32.xlu0 %v1642_v9, %s2721_s5 }
0x254b   :  { %v1645_v24 = vpop.permute.xlu0 %1644 }
0x254c   :  { %2553 = vmatmul.mubr.msk.f32.vlgmr.msra.gmra.mxu1 %vm179_vm2, %v1645_v24 }
0x254d   :  { %2567 = vmatpush3.msra.mxu1 %v2990_v53  ;;  %2574 = vmatprep.mubr.msk.f32.mxu1 %vm2720_vm1, %v2719_v5  ;;  %v1111_v53 = vadd.f32 %v3109_v8, %v3054_v13  ;;  %v35_v8 = vld [vmem:[%s3265_s1 + $0x80] sm:$0xff] }
0x254e   :  { %2568 = vmatprep.subr.mxu1 %v2719_v5  ;;  %2577 = vmatprep.subr.mxu0 %v35_v8 }
0x254f   :  { %2569 = vmatpush3.msra.mxu1 %v2996_v54 }
0x2550   :  { %2570 = vmatprep.subr.mxu1 %v2719_v5 }
0x2551   :  { %2571 = vmatpush3.msra.mxu1 %v3003_v55 }
0x2552   :  { %2572 = vmatprep.subr.mxu1 %v2719_v5 }
0x2553   :  { %2573 = vmatpush3.msra.mxu1 %v3010_v56 }
0x260c   :  { %v1714_v25 = vpop.f32.mrf.mxu1 }
0x260d   :  { %v1715_v11 = vadd.f32 %v3045_v63, %v1714_v25 }
0x260e   :  { %v2554_v26 = vpop.f32.mrf.mxu1 }
0x260f   :  { %1726 = vrot.lane.b32.xlu1 %v1715_v11, %s2721_s5  ;;  %v1718_v27 = vadd.f32 %v1715_v11, %v1111_v53  ;;  %v2237_v11 = vld [vmem:[%s3265_s1 + $0x8c] ss:$0 sm:$0xff] }
0x2611   :  { %v2232_v28 = vmul.f32 -1.442695, %v1718_v27 }
0x2613   :  { %2683 = vpow2.f32 %v2232_v28 }
0x2620   :  { %v2684_v54 = vpop.eup %2683 }
0x2621   :  { %v1722_v29 = vadd.f32 1.0, %v2684_v54 }
0x2623   :  { %2685 = vrcp.f32 %v1722_v29 }
0x2630   :  { %v2686_v55 = vpop.eup %2685 }
0x2681   :  { %v1727_v12 = vpop.permute.xlu1 %1726 }
0x2682   :  { %v1729_v5 = vmul.f32 %v2686_v55, %v1727_v12 }
0x2684   :  { %1731 = vrot.lane.b32.xlu0 %v1729_v5, %s2721_s5 }
0x26f6   :  { %v1732_v56 = vpop.permute.xlu0 %1731 }
0x26f7   :  { %v1734_v31 = vadd.f32 %v1732_v56, %v1111_v53 }
0x26f9   :  { %2687 = vtanh.f32 %v1734_v31 }
0x2706   :  { %v2688_v32 = vpop.eup %2687 }
0x2707   :  { %v1736_v33 = vsub.f32 %v1642_v9, %v2688_v32 }
0x2709   :  { %1738 = vrot.lane.b32.xlu1 %v1736_v33, %s2722_s8 }
0x277b   :  { %v1739_v34 = vpop.permute.xlu1 %1738 }
0x277c   :  { %v1741_v36 = vmul.f32 %v2686_v55, %v1739_v34 }
0x277e   :  { %1743 = vrot.lane.b32.xlu0 %v1741_v36, %s2723_s9 }
0x27f0   :  { %v1744_v14 = vpop.permute.xlu0 %1743 }
0x27f1   :  { %v1746_v22 = vadd.f32 %v2688_v32, %v1744_v14 }
0x27f3   :  { %1748 = vrot.lane.b32.xlu1 %v1746_v22, %s2721_s5 }
0x2865   :  { %v1749_v37 = vpop.permute.xlu1 %1748 }
0x2866   :  { %2564 = vmatmul.mubr.msk.f32.vlgmr.msra.gmra.mxu0 %vm179_vm2, %v1749_v37 }
0x2867   :  { %2578 = vmatpush3.msra.mxu0 %v35_v8  ;;  %2585 = vmatprep.mubr.msk.f32.mxu0 %vm179_vm2, %v3066_v16 }
0x2868   :  { %2579 = vmatprep.subr.mxu0 %v34_v38 }
0x2869   :  { %2580 = vmatpush3.msra.mxu0 %v34_v38 }
0x286a   :  { %2581 = vmatprep.subr.mxu0 %v33_v39 }
0x286b   :  { %2582 = vmatpush3.msra.mxu0 %v33_v39 }
0x286c   :  { %2583 = vmatprep.subr.mxu0 %v32_v40 }
0x286d   :  { %2584 = vmatpush3.msra.mxu0 %v32_v40 }
0x286e   :  { %2586 = vmatmul.mubr.msk.f32.vlgmr.msra.gmra.mxu0 %vm179_vm2, %v3095_v2 }
0x286f   :  { %2588 = vmatprep.mubr.msk.f32.mxu0 %vm179_vm2, %v3124_v35 }
0x2872   :  { %2589 = vmatmul.mubr.msk.f32.gmra.mxu0 %vm179_vm2, %v3145_v51 }
0x2873   :  { %2591 = vmatprep.mubr.msk.f32.mxu0 %vm179_vm2, %v1645_v24 }
0x2876   :  { %2592 = vmatmul.mubr.msk.f32.gmra.mxu0 %vm179_vm2, %v1749_v37 }
0x2926   :  { %v1818_v16 = vpop.f32.mrf.mxu0 }
0x2927   :  { %v1819_v41 = vadd.f32 %v3045_v63, %v1818_v16 }
0x2928   :  { %v2565_v61 = vpop.f32.mrf.mxu0 }
0x2929   :  { %1830 = vrot.lane.b32.xlu0 %v1819_v41, %s2721_s5  ;;  %v1822_v2 = vadd.f32 %v1819_v41, %v1116_v42 }
0x292b   :  { %v2234_v43 = vmul.f32 -1.442695, %v1822_v2 }
0x292d   :  { %2689 = vpow2.f32 %v2234_v43 }
0x292e   :  { %v2587_v23 = vpop.f32.mrf.mxu0 }
0x292f   :  { %v2036_v12 = vadd.f32 %v2587_v23, %v2237_v11 }
0x2930   :  { %v2030_v13 = vpop.f32.mrf.mxu0 }
0x2931   :  { %v2031_v26 = vadd.f32 %v2237_v11, %v2030_v13 }
0x2932   :  { %v2590_v17 = vpop.f32.mrf.mxu0 }
0x2933   :  { %v2046_v5 = vadd.f32 %v2590_v17, %v2237_v11  ;;  %v2069_v32 = vmax.f32 %v2031_v26, %v2036_v12 }
0x2934   :  { %v2040_v25 = vpop.f32.mrf.mxu0 }
0x2935   :  { %v2041_v27 = vadd.f32 %v2237_v11, %v2040_v25 }
0x2936   :  { %v2593_v53 = vpop.f32.mrf.mxu0 }
0x2937   :  { %v2056_v56 = vadd.f32 %v2593_v53, %v2237_v11  ;;  %v2070_v33 = vmax.f32 %v2069_v32, %v2041_v27 }
0x2938   :  { %v2050_v28 = vpop.f32.mrf.mxu0 }
0x2939   :  { %v2051_v54 = vadd.f32 %v2237_v11, %v2050_v28  ;;  %v2071_v8 = vmax.f32 %v2070_v33, %v2046_v5 }
0x293a   :  { %v2690_v35 = vpop.eup %2689 }
0x293b   :  { %v1826_v30 = vadd.f32 1.0, %v2690_v35  ;;  %v2072_v34 = vmax.f32 %v2071_v8, %v2051_v54 }
0x293d   :  { %2691 = vrcp.f32 %v1826_v30  ;;  %v2073_v38 = vmax.f32 %v2072_v34, %v2056_v56 }
0x294a   :  { %v2692_v44 = vpop.eup %2691 }
0x299b   :  { %v1831_v45 = vpop.permute.xlu0 %1830 }
0x299c   :  { %v1833_v46 = vmul.f32 %v2692_v44, %v1831_v45 }
0x299e   :  { %1835 = vrot.lane.b32.xlu1 %v1833_v46, %s2721_s5 }
0x2a10   :  { %v1836_v47 = vpop.permute.xlu1 %1835 }
0x2a11   :  { %v1838_v48 = vadd.f32 %v1836_v47, %v1116_v42 }
0x2a13   :  { %2693 = vtanh.f32 %v1838_v48 }
0x2a20   :  { %v2694_v49 = vpop.eup %2693 }
0x2a21   :  { %v1840_v50 = vsub.f32 %v1746_v22, %v2694_v49 }
0x2a23   :  { %1842 = vrot.lane.b32.xlu0 %v1840_v50, %s2722_s8 }
0x2a95   :  { %v1843_v51 = vpop.permute.xlu0 %1842 }
0x2a96   :  { %v1845_v18 = vmul.f32 %v2692_v44, %v1843_v51 }
0x2a98   :  { %1847 = vrot.lane.b32.xlu1 %v1845_v18, %s2723_s9 }
0x2b0a   :  { %v1848_v52 = vpop.permute.xlu1 %1847 }
0x2b0b   :  { %v1850_v15 = vadd.f32 %v2694_v49, %v1848_v52 }
0x2b0d   :  { %1852 = vrot.lane.b32.xlu0 %v1850_v15, %s2721_s5 }
0x2b7f   :  { %v1853_v57 = vpop.permute.xlu0 %1852 }
0x2b80   :  { %2575 = vmatmul.mubr.msk.f32.vlgmr.msra.gmra.mxu1 %vm179_vm2, %v1853_v57  ;;  %2594 = vmatprep.mubr.msk.f32.mxu0 %vm179_vm2, %v1853_v57 }
0x2c40   :  { %v1922_v58 = vpop.f32.mrf.mxu1 }
0x2c41   :  { %v1923_v59 = vadd.f32 %v3045_v63, %v1922_v58 }
0x2c42   :  { %v2576_v60 = vpop.f32.mrf.mxu1 }
0x2c43   :  { %1934 = vrot.lane.b32.xlu1 %v1923_v59, %s2721_s5  ;;  %v1926_v0 = vadd.f32 %v1923_v59, %v1121_v62 }
0x2c45   :  { %v2236_v1 = vmul.f32 -1.442695, %v1926_v0 }
0x2c47   :  { %2695 = vpow2.f32 %v2236_v1 }
0x2c54   :  { %v2696_v4 = vpop.eup %2695 }
0x2c55   :  { %v1930_v7 = vadd.f32 1.0, %v2696_v4 }
0x2c57   :  { %2697 = vrcp.f32 %v1930_v7 }
0x2c64   :  { %v2698_v3 = vpop.eup %2697 }
0x2cb5   :  { %v1935_v19 = vpop.permute.xlu1 %1934 }
0x2cb6   :  { %v1937_v20 = vmul.f32 %v2698_v3, %v1935_v19 }
0x2cb8   :  { %1939 = vrot.lane.b32.xlu0 %v1937_v20, %s2721_s5 }
0x2d2a   :  { %v1940_v6 = vpop.permute.xlu0 %1939 }
0x2d2b   :  { %v1942_v21 = vadd.f32 %v1940_v6, %v1121_v62 }
0x2d2d   :  { %2699 = vtanh.f32 %v1942_v21 }
0x2d3a   :  { %v2700_v63 = vpop.eup %2699 }
0x2d3b   :  { %v1944_v10 = vsub.f32 %v1850_v15, %v2700_v63 }
0x2d3d   :  { %1946 = vrot.lane.b32.xlu1 %v1944_v10, %s2722_s8 }
0x2daf   :  { %v1947_v9 = vpop.permute.xlu1 %1946 }
0x2db0   :  { %v1949_v24 = vmul.f32 %v2698_v3, %v1947_v9 }
0x2db2   :  { %1951 = vrot.lane.b32.xlu0 %v1949_v24, %s2723_s9 }
0x2db6   :  { %2113 = vrot.lane.b32.xlu0 %v2031_v26, %s2724_s17 }
0x2dba   :  { %2131 = vrot.lane.b32.xlu0 %v2041_v27, %s2724_s17 }
0x2dbe   :  { %2149 = vrot.lane.b32.xlu0 %v2051_v54, %s2724_s17 }
0x2e24   :  { %v1952_v29 = vpop.permute.xlu0 %1951 }
0x2e25   :  { %v1954_v55 = vadd.f32 %v2700_v63, %v1952_v29 }
0x2e27   :  { %1960 = vrot.lane.b32.xlu1 %v1954_v55, %s2721_s5 }
0x2e28   :  { %v2114_v25 = vpop.permute.xlu0 %2113 }
0x2e2b   :  { %2122 = vrot.lane.b32.xlu1 %v2036_v12, %s2724_s17 }
0x2e2c   :  { %v2132_v28 = vpop.permute.xlu0 %2131 }
0x2e2f   :  { %2140 = vrot.lane.b32.xlu1 %v2046_v5, %s2724_s17 }
0x2e33   :  { %2158 = vrot.lane.b32.xlu1 %v2056_v56, %s2724_s17 }
0x2e99   :  { %v1961_v31 = vpop.permute.xlu1 %1960 }
0x2e9a   :  { %2595 = vmatmul.mubr.msk.f32.gmra.mxu0 %vm179_vm2, %v1961_v31 }
0x2f5a   :  { %v2596_v36 = vpop.f32.mrf.mxu0 }
0x2f5b   :  { %v2066_v14 = vadd.f32 %v2596_v36, %v2237_v11 }
0x2f5c   :  { %v2060_v22 = vpop.f32.mrf.mxu0 }
0x2f5d   :  { %v2061_v37 = vadd.f32 %v2237_v11, %v2060_v22  ;;  %2176 = vrot.lane.b32.xlu1 %v2066_v14, %s2724_s17  ;;  %v2123_v11 = vpop.permute.xlu1 %2122 }
0x2f5f   :  { %v2074_v39 = vmax.f32 %v2073_v38, %v2061_v37  ;;  %2167 = vrot.lane.b32.xlu0 %v2061_v37, %s2724_s17 }
0x2f61   :  { %v2075_v40 = vmax.f32 %v2074_v39, %v2066_v14  ;;  %v2141_v55 = vpop.permute.xlu1 %2140 }
0x2f63   :  { %v2076_v16 = vsub.f32 %v2031_v26, %v2075_v40  ;;  %v2079_v41 = vsub.f32 %v2036_v12, %v2075_v40  ;;  %v2082_v61 = vsub.f32 %v2041_v27, %v2075_v40  ;;  %v2085_v42 = vsub.f32 %v2046_v5, %v2075_v40 }
0x2f64   :  { %v2088_v30 = vsub.f32 %v2051_v54, %v2075_v40  ;;  %v2091_v45 = vsub.f32 %v2056_v56, %v2075_v40  ;;  %v2094_v47 = vsub.f32 %v2061_v37, %v2075_v40  ;;  %v2097_v49 = vsub.f32 %v2066_v14, %v2075_v40  ;;  %v2150_v56 = vpop.permute.xlu0 %2149 }
0x2f65   :  { %v2077_v2 = vmul.f32 1.442695, %v2076_v16  ;;  %v2080_v43 = vmul.f32 1.442695, %v2079_v41  ;;  %v2083_v35 = vmul.f32 1.442695, %v2082_v61  ;;  %v2159_v32 = vpop.permute.xlu1 %2158 }
0x2f66   :  { %v2086_v44 = vmul.f32 1.442695, %v2085_v42  ;;  %v2089_v46 = vmul.f32 1.442695, %v2088_v30  ;;  %v2092_v48 = vmul.f32 1.442695, %v2091_v45 }
0x2f67   :  { %2701 = vpow2.f32 %v2077_v2  ;;  %v2095_v50 = vmul.f32 1.442695, %v2094_v47  ;;  %v2098_v51 = vmul.f32 1.442695, %v2097_v49 }
0x2f68   :  { %2703 = vpow2.f32 %v2080_v43 }
0x2f69   :  { %2705 = vpow2.f32 %v2083_v35 }
0x2f6a   :  { %2707 = vpow2.f32 %v2086_v44 }
0x2f6b   :  { %2709 = vpow2.f32 %v2089_v46 }
0x2f6c   :  { %2711 = vpow2.f32 %v2092_v48 }
0x2f6d   :  { %2713 = vpow2.f32 %v2095_v50 }
0x2f6e   :  { %2715 = vpow2.f32 %v2098_v51 }
0x2f74   :  { %v2702_v18 = vpop.eup %2701 }
0x2f75   :  { %v2704_v52 = vpop.eup %2703 }
0x2f76   :  { %v2100_v15 = vadd.f32 %v2704_v52, %v2702_v18  ;;  %v2706_v57 = vpop.eup %2705 }
0x2f77   :  { %v2708_v59 = vpop.eup %2707 }
0x2f78   :  { %v2101_v58 = vadd.f32 %v2706_v57, %v2100_v15  ;;  %v2710_v62 = vpop.eup %2709 }
0x2f79   :  { %v2712_v1 = vpop.eup %2711 }
0x2f7a   :  { %v2102_v60 = vadd.f32 %v2708_v59, %v2101_v58  ;;  %v2714_v7 = vpop.eup %2713 }
0x2f7b   :  { %v2716_v19 = vpop.eup %2715 }
0x2f7c   :  { %v2103_v0 = vadd.f32 %v2710_v62, %v2102_v60 }
0x2f7e   :  { %v2104_v4 = vadd.f32 %v2712_v1, %v2103_v0 }
0x2f80   :  { %v2105_v3 = vadd.f32 %v2714_v7, %v2104_v4 }
0x2f82   :  { %v2106_v20 = vadd.f32 %v2716_v19, %v2105_v3 }
0x2f84   :  { %2717 = vrcp.f32 %v2106_v20 }
0x2f91   :  { %v2718_v6 = vpop.eup %2717 }
0x2f92   :  { %v2172_v21 = vmul.f32 %v2718_v6, %v2716_v19  ;;  %v2109_v63 = vmul.f32 %v2718_v6, %v2702_v18  ;;  %v2118_v10 = vmul.f32 %v2718_v6, %v2704_v52  ;;  %v2127_v23 = vmul.f32 %v2718_v6, %v2706_v57 }
0x2f93   :  { %v2136_v13 = vmul.f32 %v2718_v6, %v2708_v59  ;;  %v2145_v17 = vmul.f32 %v2718_v6, %v2710_v62  ;;  %v2154_v9 = vmul.f32 %v2718_v6, %v2712_v1  ;;  %v2163_v24 = vmul.f32 %v2718_v6, %v2714_v7 }
0x2f94   :  { %2252 = vst.msk [vmem:[%s3267_s2 + $0x38] sm:$0xff] %vm2110_vm3, %v2172_v21  ;;  %2111 = vst.msk [vmem:[%s3267_s2] sm:$0xff] %vm2110_vm3, %v2109_v63  ;;  %v2116_v26 = vmul.f32 %v2114_v25, %v2109_v63  ;;  %v2125_v53 = vmul.f32 %v2123_v11, %v2118_v10  ;;  %v2134_v54 = vmul.f32 %v2132_v28, %v2127_v23 }
0x2f95   :  { %2246 = vst.msk [vmem:[%s3267_s2 + $0x8] sm:$0xff] %vm2110_vm3, %v2118_v10  ;;  %2247 = vst.msk [vmem:[%s3267_s2 + $0x10] sm:$0xff] %vm2110_vm3, %v2127_v23  ;;  %v2143_v12 = vmul.f32 %v2141_v55, %v2136_v13  ;;  %v2152_v31 = vmul.f32 %v2150_v56, %v2145_v17  ;;  %v2161_v8 = vmul.f32 %v2159_v32, %v2154_v9 }
0x2f96   :  { %2248 = vst.msk [vmem:[%s3267_s2 + $0x18] sm:$0xff] %vm2110_vm3, %v2136_v13  ;;  %2249 = vst.msk [vmem:[%s3267_s2 + $0x20] sm:$0xff] %vm2110_vm3, %v2145_v17  ;;  %v2126_v27 = vadd.f32 %v2125_v53, %v2116_v26 }
0x2f97   :  { %2250 = vst.msk [vmem:[%s3267_s2 + $0x28] sm:$0xff] %vm2110_vm3, %v2154_v9  ;;  %2251 = vst.msk [vmem:[%s3267_s2 + $0x30] sm:$0xff] %vm2110_vm3, %v2163_v24 }
0x2f98   :  { %v2135_v29 = vadd.f32 %v2134_v54, %v2126_v27 }
0x2f9a   :  { %v2144_v5 = vadd.f32 %v2143_v12, %v2135_v29 }
0x2f9c   :  { %v2153_v33 = vadd.f32 %v2152_v31, %v2144_v5 }
0x2f9e   :  { %v2162_v14 = vadd.f32 %v2161_v8, %v2153_v33 }
0x2fcf   :  { %v2177_v34 = vpop.permute.xlu1 %2176 }
0x2fd0   :  { %v2179_v37 = vmul.f32 %v2177_v34, %v2172_v21 }
0x2fd1   :  { %v2168_v36 = vpop.permute.xlu0 %2167 }
0x2fd2   :  { %v2170_v22 = vmul.f32 %v2168_v36, %v2163_v24 }
0x2fd4   :  { %v2171_v38 = vadd.f32 %v2170_v22, %v2162_v14 }
0x2fd6   :  { %v2180_v39 = vadd.f32 %v2179_v37, %v2171_v38 }
0x2fd8   :  { %2253 = vst.msk [vmem:[%s3267_s2 + $0x40] sm:$0xff] %vm2110_vm3, %v2180_v39 }

</bundles_post_ra>
